<compile_context>
chip_gen: v6e
topology: v6e:2x2x1
jax: 0.10.0
libtpu: 0.0.40
codegen_flags: <defaults>
</compile_context>

<pallas_src>
import functools
import math

import jax
import jax.numpy as jnp
from jax.experimental import pallas as pl
from jax.experimental.pallas import tpu as pltpu


# ------------------------------ small helpers -------------------------------

def _round_up(x, m):
    return ((x + m - 1) // m) * m


def _pad_to(a, shape):
    out = jnp.zeros(shape, a.dtype)
    return out.at[tuple(slice(0, s) for s in a.shape)].set(a)


# ------------------------------ fused ViT kernel -----------------------------

def _vit_kernel(patches_ref, conv_w_ref, conv_b_ref, cls_ref, pos_ref,
                ln1g_ref, ln1b_ref, wqkv_ref, bqkv_ref, wo_ref, bo_ref,
                ln2g_ref, ln2b_ref, w1_ref, b1_ref, w2_ref, b2_ref,
                lnfg_ref, lnfb_ref, bnw_ref, bnb_ref, bnm_ref, bnv_ref,
                o_ref, x_scr,
                *, s_valid, e_valid, nheads, head_dim, ln_eps, bn_eps):
    """One encoder layer per grid step; embed at l==0, head at l==L-1."""
    l = pl.program_id(1)
    n_per, sp, ep = x_scr.shape
    m = n_per * sp
    inv_e = 1.0 / e_valid

    # Masks built once per grid step and reused everywhere (both LayerNorms,
    # row gating).  Padded lanes/rows are kept at exactly zero across layers.
    col = jax.lax.broadcasted_iota(jnp.int32, (n_per, sp, ep), 2)
    feat_mask = (col < e_valid).astype(jnp.float32)
    row = jax.lax.broadcasted_iota(jnp.int32, (n_per, sp, ep), 1)
    row_mask = (row < s_valid).astype(jnp.float32)

    # ---- first layer step: patch-embed matmul + class token + pos embedding ----
    @pl.when(l == 0)
    def _embed():
        pt = patches_ref[...].astype(jnp.bfloat16)                    # (n_per, SP, KP)
        tok = jnp.dot(pt.reshape(m, pt.shape[-1]), conv_w_ref[...],
                      preferred_element_type=jnp.float32)
        tok = tok.reshape(n_per, sp, ep) + conv_b_ref[...]
        tok = jnp.where(row == 0, cls_ref[...], tok)                  # row 0 = class token
        x_scr[...] = (tok + pos_ref[...]) * row_mask                  # padded rows stay 0

    x = x_scr[...]                                                    # (n_per, SP, EP) f32

    def layer_norm(v, g, b):
        mu = jnp.sum(v, axis=-1, keepdims=True) * inv_e
        d = (v - mu) * feat_mask
        var = jnp.sum(d * d, axis=-1, keepdims=True) * inv_e
        return d * jax.lax.rsqrt(var + ln_eps) * g + b

    # ---- attention: LN1 -> fused QKV matmul -> per-head SDPA -> fused out-proj ----
    y = layer_norm(x, ln1g_ref[0], ln1b_ref[0])
    qkv = jnp.dot(y.reshape(m, ep).astype(jnp.bfloat16), wqkv_ref[0],
                  preferred_element_type=jnp.float32) + bqkv_ref[0]   # (M, QP)
    qkv = qkv.reshape(n_per, sp, qkv.shape[-1])

    scale = 1.0 / math.sqrt(head_dim)
    kmask = jax.lax.broadcasted_iota(jnp.int32, (n_per, sp, sp), 2) < s_valid
    ctx_heads = []
    for h in range(nheads):                                           # static unroll
        q_h = qkv[..., h * head_dim:(h + 1) * head_dim].astype(jnp.bfloat16)
        k_h = qkv[..., e_valid + h * head_dim:
                  e_valid + (h + 1) * head_dim].astype(jnp.bfloat16)
        v_h = qkv[..., 2 * e_valid + h * head_dim:
                  2 * e_valid + (h + 1) * head_dim].astype(jnp.bfloat16)
        s = jnp.einsum('bqd,bkd->bqk', q_h, k_h,
                       preferred_element_type=jnp.float32) * scale
        s = jnp.where(kmask, s, -1e30)                                # mask padded keys
        s = s - jnp.max(s, axis=-1, keepdims=True)
        p = jnp.exp(s)
        p = p * pl.reciprocal(jnp.sum(p, axis=-1, keepdims=True), approx=True)
        ctx_heads.append(jnp.einsum('bqk,bkd->bqd', p.astype(jnp.bfloat16), v_h,
                                    preferred_element_type=jnp.float32))
    ctx = jnp.concatenate(ctx_heads, axis=-1)                         # (n_per, SP, E)
    attn = jnp.dot(ctx.reshape(m, e_valid).astype(jnp.bfloat16), wo_ref[0],
                   preferred_element_type=jnp.float32).reshape(n_per, sp, ep)
    x1 = x + attn + bo_ref[0]                                         # residual 1

    # ---- MLP: LN2 -> Linear -> exact GELU -> Linear -> residual ----
    y2 = layer_norm(x1, ln2g_ref[0], ln2b_ref[0])
    h1 = jnp.dot(y2.reshape(m, ep).astype(jnp.bfloat16), w1_ref[0],
                 preferred_element_type=jnp.float32) + b1_ref[0]
    g1 = 0.5 * h1 * (1.0 + jax.lax.erf(h1 * (1.0 / math.sqrt(2.0))))
    h2 = jnp.dot(g1.astype(jnp.bfloat16), w2_ref[0],
                 preferred_element_type=jnp.float32) + b2_ref[0]
    x_new = (x1 + h2.reshape(n_per, sp, ep)) * row_mask               # padded rows -> 0
    x_scr[...] = x_new

    # ---- last layer step: final encoder LN (class token only) + eval BatchNorm1d ----
    @pl.when(l == pl.num_programs(1) - 1)
    def _head():
        cls = x_new[:, 0, :]                                          # (n_per, EP)
        cmask = (jax.lax.broadcasted_iota(jnp.int32, cls.shape, 1)
                 < e_valid).astype(jnp.float32)
        mu = jnp.sum(cls, axis=-1, keepdims=True) * inv_e
        d = (cls - mu) * cmask
        var = jnp.sum(d * d, axis=-1, keepdims=True) * inv_e
        yf = d * jax.lax.rsqrt(var + ln_eps) * lnfg_ref[...] + lnfb_ref[...]
        z = (yf - bnm_ref[...]) * jax.lax.rsqrt(bnv_ref[...] + bn_eps)
        z = z * bnw_ref[...] + bnb_ref[...]
        r = o_ref.shape[1]
        if n_per < r:                                                 # static
            z = jnp.concatenate(
                [z, jnp.zeros((r - n_per, ep), z.dtype)], axis=0)
        o_ref[0] = z


# ----------------------------- model definition ------------------------------

CFG = dict(
    batch=2, channels=3, height=16, width=16,   # image size (must match)
    patch=8, hidden=32, heads=4, mlp_dim=64, num_layers=2,
    feature_dim=32,                             # config.MODEL.FEATURE_DIM == hidden_dim
)


def init_params(key, cfg):
    """Logical (torch-layout) parameters."""
    C, p, E = cfg['channels'], cfg['patch'], cfg['hidden']
    mlp, L, F = cfg['mlp_dim'], cfg['num_layers'], cfg['feature_dim']
    seq = (cfg['height'] // p) * (cfg['width'] // p)
    S = seq + 1
    keys = iter(jax.random.split(key, 8 + 8 * L))
    nrm = lambda shape, s=0.02: s * jax.random.normal(next(keys), shape, jnp.float32)

    params = {
        'conv_w': nrm((E, C, p, p)),
        'conv_b': jnp.zeros((E,), jnp.float32),
        'class_token': nrm((1, 1, E)),
        'pos_embedding': nrm((1, S, E)),
        'lnf_g': jnp.ones((E,), jnp.float32), 'lnf_b': jnp.zeros((E,), jnp.float32),
        # BatchNorm1d: weight ~ N(1, 0.02), bias = 0, running stats at init
        'bn_w': 1.0 + nrm((F,)), 'bn_b': jnp.zeros((F,), jnp.float32),
        'bn_mean': jnp.zeros((F,), jnp.float32), 'bn_var': jnp.ones((F,), jnp.float32),
        'layers': [],
    }
    for _ in range(L):
        params['layers'].append({
            'ln1_g': jnp.ones((E,), jnp.float32), 'ln1_b': jnp.zeros((E,), jnp.float32),
            'in_w': nrm((3 * E, E)), 'in_b': jnp.zeros((3 * E,), jnp.float32),
            'out_w': nrm((E, E)), 'out_b': jnp.zeros((E,), jnp.float32),
            'ln2_g': jnp.ones((E,), jnp.float32), 'ln2_b': jnp.zeros((E,), jnp.float32),
            'mlp_w1': nrm((mlp, E)), 'mlp_b1': jnp.zeros((mlp,), jnp.float32),
            'mlp_w2': nrm((E, mlp)), 'mlp_b2': jnp.zeros((E,), jnp.float32),
        })
    return params


def pack_params(params, cfg):
    """Pad / transpose / cast parameters into the dense (fused) bf16 kernel layout."""
    C, p, E, H = cfg['channels'], cfg['patch'], cfg['hidden'], cfg['heads']
    mlp, L = cfg['mlp_dim'], cfg['num_layers']
    Dh = E // H
    K = C * p * p
    seq = (cfg['height'] // p) * (cfg['width'] // p)
    S = seq + 1
    EP, KP = _round_up(E, 128), _round_up(K, 128)
    MP, QP = _round_up(mlp, 128), _round_up(3 * E, 128)
    SP = _round_up(S, 8)
    bf = jnp.bfloat16

    def vec(a, n_pad):
        return _pad_to(a.reshape(1, -1), (1, n_pad))

    def stack(fn):
        return jnp.stack([fn(lp) for lp in params['layers']], axis=0)

    packed = {
        'conv_w': _pad_to(params['conv_w'].reshape(E, K).T, (KP, EP)).astype(bf),
        'conv_b': vec(params['conv_b'], EP),
        'cls': _pad_to(params['class_token'].reshape(1, E), (1, EP)),
        'pos': _pad_to(params['pos_embedding'].reshape(S, E), (SP, EP)),
        'lnf_g': vec(params['lnf_g'], EP), 'lnf_b': vec(params['lnf_b'], EP),
        'bn_w': vec(params['bn_w'], EP), 'bn_b': vec(params['bn_b'], EP),
        'bn_mean': vec(params['bn_mean'], EP), 'bn_var': vec(params['bn_var'], EP),
        # Per-layer weights stacked along a leading layer axis (streamed over the
        # "arbitrary" layer grid axis).  Fused dense layouts: no per-head padding.
        'ln1_g': stack(lambda lp: vec(lp['ln1_g'], EP)),
        'ln1_b': stack(lambda lp: vec(lp['ln1_b'], EP)),
        'wqkv': stack(lambda lp: _pad_to(lp['in_w'].T, (EP, QP)).astype(bf)),
        'bqkv': stack(lambda lp: vec(lp['in_b'], QP)),
        'wo': stack(lambda lp: _pad_to(lp['out_w'].T, (E, EP)).astype(bf)),
        'bo': stack(lambda lp: vec(lp['out_b'], EP)),
        'ln2_g': stack(lambda lp: vec(lp['ln2_g'], EP)),
        'ln2_b': stack(lambda lp: vec(lp['ln2_b'], EP)),
        'w1': stack(lambda lp: _pad_to(lp['mlp_w1'].T, (EP, MP)).astype(bf)),
        'b1': stack(lambda lp: vec(lp['mlp_b1'], MP)),
        'w2': stack(lambda lp: _pad_to(lp['mlp_w2'].T, (MP, EP)).astype(bf)),
        'b2': stack(lambda lp: vec(lp['mlp_b2'], EP)),
    }
    dims = dict(E=E, K=K, Dh=Dh, S=S, SP=SP, EP=EP, KP=KP, MP=MP, QP=QP, H=H, L=L)
    return packed, dims


def vit_forward(packed, x, cfg, dims):
    """Eval-mode forward of ViT.forward(x, train=False) — one fused pallas_call."""
    n, c, h, w = x.shape
    p = cfg['patch']
    assert h == cfg['height'] and w == cfg['width'], 'Wrong image size!'
    nh, nw = h // p, w // p
    seq = nh * nw
    E, K, S = dims['E'], dims['K'], dims['S']
    SP, KP, EP = dims['SP'], dims['KP'], dims['EP']
    L, H, Dh = dims['L'], dims['H'], dims['Dh']

    # Split the batch across (up to) two "parallel" grid steps (v7x: 2 TensorCores);
    # the samples inside each split are folded into the matmul M dimension.
    NB = 2 if (n >= 2 and n % 2 == 0) else 1
    n_per = n // NB
    R = _round_up(n_per, 8)

    # conv_proj (stride-p patch conv) as im2col; row 0 reserved for the class token.
    patches = x.reshape(n, c, nh, p, nw, p).transpose(0, 2, 4, 1, 3, 5).reshape(n, seq, K)
    patches = jnp.pad(patches, ((0, 0), (1, SP - S), (0, KP - K)))    # (n, SP, KP)

    # TODO(synk): PatchShuffle block is train-only (train=False here) — not implemented.

    def const_spec(a):
        nd = a.ndim
        return pl.BlockSpec(a.shape, lambda b, l, _nd=nd: (0,) * _nd)

    def layer_spec(a):
        nd = a.ndim
        return pl.BlockSpec((1,) + a.shape[1:],
                            lambda b, l, _nd=nd: (l,) + (0,) * (_nd - 1))

    const_args = (packed['conv_w'], packed['conv_b'], packed['cls'], packed['pos'])
    layer_args = (packed['ln1_g'], packed['ln1_b'], packed['wqkv'], packed['bqkv'],
                  packed['wo'], packed['bo'], packed['ln2_g'], packed['ln2_b'],
                  packed['w1'], packed['b1'], packed['w2'], packed['b2'])
    head_args = (packed['lnf_g'], packed['lnf_b'], packed['bn_w'], packed['bn_b'],
                 packed['bn_mean'], packed['bn_var'])

    in_specs = ([pl.BlockSpec((n_per, SP, KP), lambda b, l: (b, 0, 0))]
                + [const_spec(a) for a in const_args]
                + [layer_spec(a) for a in layer_args]
                + [const_spec(a) for a in head_args])

    out = pl.pallas_call(
        functools.partial(_vit_kernel, s_valid=S, e_valid=E, nheads=H,
                          head_dim=Dh, ln_eps=1e-6, bn_eps=1e-5),
        out_shape=jax.ShapeDtypeStruct((NB, R, EP), jnp.float32),
        grid=(NB, L),
        in_specs=in_specs,
        out_specs=pl.BlockSpec((1, R, EP), lambda b, l: (b, 0, 0)),
        scratch_shapes=[pltpu.VMEM((n_per, SP, EP), jnp.float32)],
        compiler_params=pltpu.CompilerParams(
            dimension_semantics=("parallel", "arbitrary")),
    )(patches, *const_args, *layer_args, *head_args)

    return out[:, :n_per, :E].reshape(n, E)


# ----------------------------------- main ------------------------------------

if __name__ == "__main__":
    key = jax.random.PRNGKey(0)
    k_x, k_p = jax.random.split(key)

    x = jax.random.normal(
        k_x, (CFG['batch'], CFG['channels'], CFG['height'], CFG['width']), jnp.float32)
    params = init_params(k_p, CFG)
    packed, dims = pack_params(params, CFG)

    fwd = jax.jit(functools.partial(vit_forward, cfg=CFG, dims=dims))
    out = jax.block_until_ready(fwd(packed, x))

    assert out.shape == (CFG['batch'], CFG['feature_dim'])
    assert jnp.all(jnp.isfinite(out))
    print("KERNEL_OK")
</pallas_src>

<mosaic_0001>
module attributes {stable_mosaic.version = 11 : i64} {
  func.func @_vit_kernel(%arg0: i32, %arg1: i32, %arg2: memref<1x8x256xf32, #tpu.memory_space<vmem>>, %arg3: memref<256x128xbf16, #tpu.memory_space<vmem>>, %arg4: memref<1x128xf32, #tpu.memory_space<vmem>>, %arg5: memref<1x128xf32, #tpu.memory_space<vmem>>, %arg6: memref<8x128xf32, #tpu.memory_space<vmem>>, %arg7: memref<1x1x128xf32, #tpu.memory_space<vmem>>, %arg8: memref<1x1x128xf32, #tpu.memory_space<vmem>>, %arg9: memref<1x128x128xbf16, #tpu.memory_space<vmem>>, %arg10: memref<1x1x128xf32, #tpu.memory_space<vmem>>, %arg11: memref<1x32x128xbf16, #tpu.memory_space<vmem>>, %arg12: memref<1x1x128xf32, #tpu.memory_space<vmem>>, %arg13: memref<1x1x128xf32, #tpu.memory_space<vmem>>, %arg14: memref<1x1x128xf32, #tpu.memory_space<vmem>>, %arg15: memref<1x128x128xbf16, #tpu.memory_space<vmem>>, %arg16: memref<1x1x128xf32, #tpu.memory_space<vmem>>, %arg17: memref<1x128x128xbf16, #tpu.memory_space<vmem>>, %arg18: memref<1x1x128xf32, #tpu.memory_space<vmem>>, %arg19: memref<1x128xf32, #tpu.memory_space<vmem>>, %arg20: memref<1x128xf32, #tpu.memory_space<vmem>>, %arg21: memref<1x128xf32, #tpu.memory_space<vmem>>, %arg22: memref<1x128xf32, #tpu.memory_space<vmem>>, %arg23: memref<1x128xf32, #tpu.memory_space<vmem>>, %arg24: memref<1x128xf32, #tpu.memory_space<vmem>>, %arg25: memref<1x8x128xf32, #tpu.memory_space<vmem>>, %arg26: memref<1x8x128xf32, #tpu.memory_space<vmem>>) attributes {dimension_semantics = [#tpu.dimension_semantics<parallel>, #tpu.dimension_semantics<arbitrary>], iteration_bounds = array<i64: 2, 2>, scalar_prefetch = 0 : i64, scratch_operands = 1 : i64, tpu.core_type = #tpu.core_type<tc>, window_params = [{transform_indices = @transform_0, window_bounds = array<i64: 1, 8, 256>}, {pipeline_mode = #tpu.pipeline_mode<synchronous>, transform_indices = @transform_1, window_bounds = array<i64: 256, 128>}, {pipeline_mode = #tpu.pipeline_mode<synchronous>, transform_indices = @transform_2, window_bounds = array<i64: 1, 128>}, {pipeline_mode = #tpu.pipeline_mode<synchronous>, transform_indices = @transform_3, window_bounds = array<i64: 1, 128>}, {pipeline_mode = #tpu.pipeline_mode<synchronous>, transform_indices = @transform_4, window_bounds = array<i64: 8, 128>}, {transform_indices = @transform_5, window_bounds = array<i64: 1, 1, 128>}, {transform_indices = @transform_6, window_bounds = array<i64: 1, 1, 128>}, {transform_indices = @transform_7, window_bounds = array<i64: 1, 128, 128>}, {transform_indices = @transform_8, window_bounds = array<i64: 1, 1, 128>}, {transform_indices = @transform_9, window_bounds = array<i64: 1, 32, 128>}, {transform_indices = @transform_10, window_bounds = array<i64: 1, 1, 128>}, {transform_indices = @transform_11, window_bounds = array<i64: 1, 1, 128>}, {transform_indices = @transform_12, window_bounds = array<i64: 1, 1, 128>}, {transform_indices = @transform_13, window_bounds = array<i64: 1, 128, 128>}, {transform_indices = @transform_14, window_bounds = array<i64: 1, 1, 128>}, {transform_indices = @transform_15, window_bounds = array<i64: 1, 128, 128>}, {transform_indices = @transform_16, window_bounds = array<i64: 1, 1, 128>}, {pipeline_mode = #tpu.pipeline_mode<synchronous>, transform_indices = @transform_17, window_bounds = array<i64: 1, 128>}, {pipeline_mode = #tpu.pipeline_mode<synchronous>, transform_indices = @transform_18, window_bounds = array<i64: 1, 128>}, {pipeline_mode = #tpu.pipeline_mode<synchronous>, transform_indices = @transform_19, window_bounds = array<i64: 1, 128>}, {pipeline_mode = #tpu.pipeline_mode<synchronous>, transform_indices = @transform_20, window_bounds = array<i64: 1, 128>}, {pipeline_mode = #tpu.pipeline_mode<synchronous>, transform_indices = @transform_21, window_bounds = array<i64: 1, 128>}, {pipeline_mode = #tpu.pipeline_mode<synchronous>, transform_indices = @transform_22, window_bounds = array<i64: 1, 128>}, {transform_indices = @transform_23, window_bounds = array<i64: 1, 8, 128>}]} {
    %0 = tpu.iota {dimensions = array<i32: 2>} : vector<1x8x128xi32>
    %c32_i32 = arith.constant 32 : i32
    %1 = vector.broadcast %c32_i32 : i32 to vector<1x8x128xi32>
    %2 = arith.cmpi slt, %0, %1 : vector<1x8x128xi32>
    %3 = arith.extui %2 : vector<1x8x128xi1> to vector<1x8x128xi32>
    %4 = arith.sitofp %3 : vector<1x8x128xi32> to vector<1x8x128xf32>
    %5 = tpu.iota {dimensions = array<i32: 1>} : vector<1x8x128xi32>
    %c5_i32 = arith.constant 5 : i32
    %6 = vector.broadcast %c5_i32 : i32 to vector<1x8x128xi32>
    %7 = arith.cmpi slt, %5, %6 : vector<1x8x128xi32>
    %8 = arith.extui %7 : vector<1x8x128xi1> to vector<1x8x128xi32>
    %9 = arith.sitofp %8 : vector<1x8x128xi32> to vector<1x8x128xf32>
    %c0_i32 = arith.constant 0 : i32
    %10 = arith.cmpi eq, %arg1, %c0_i32 : i32
    %11 = arith.extui %10 : i1 to i32
    %c0_i32_0 = arith.constant 0 : i32
    %12 = arith.cmpi ne, %11, %c0_i32_0 : i32
    scf.if %12 {
      %c0_84 = arith.constant 0 : index
      %c0_85 = arith.constant 0 : index
      %c0_86 = arith.constant 0 : index
      %218 = vector.load %arg2[%c0_84, %c0_85, %c0_86] : memref<1x8x256xf32, #tpu.memory_space<vmem>>, vector<1x8x256xf32>
      %219 = arith.truncf %218 : vector<1x8x256xf32> to vector<1x8x256xbf16>
      %220 = vector.shape_cast %219 : vector<1x8x256xbf16> to vector<8x256xbf16>
      %c0_87 = arith.constant 0 : index
      %c0_88 = arith.constant 0 : index
      %221 = vector.load %arg3[%c0_87, %c0_88] : memref<256x128xbf16, #tpu.memory_space<vmem>>, vector<256x128xbf16>
      %cst_89 = arith.constant dense<0.000000e+00> : vector<8x128xf32>
      %222 = tpu.matmul %220, %221, %cst_89 {dimension_numbers = #tpu.dot_dimension_numbers<[1], [0], [0], [1], [0, 0, 1, 1], [], []>} : vector<8x256xbf16>, vector<256x128xbf16>, vector<8x128xf32> -> vector<8x128xf32>
      %223 = vector.shape_cast %222 : vector<8x128xf32> to vector<1x8x128xf32>
      %c0_90 = arith.constant 0 : index
      %c0_91 = arith.constant 0 : index
      %224 = vector.load %arg4[%c0_90, %c0_91] : memref<1x128xf32, #tpu.memory_space<vmem>>, vector<1x128xf32>
      %225 = vector.shape_cast %224 : vector<1x128xf32> to vector<1x1x128xf32>
      %226 = vector.broadcast %225 : vector<1x1x128xf32> to vector<1x8x128xf32>
      %227 = arith.addf %223, %226 : vector<1x8x128xf32>
      %c0_i32_92 = arith.constant 0 : i32
      %228 = vector.broadcast %c0_i32_92 : i32 to vector<1x8x128xi32>
      %229 = arith.cmpi eq, %5, %228 : vector<1x8x128xi32>
      %c0_93 = arith.constant 0 : index
      %c0_94 = arith.constant 0 : index
      %230 = vector.load %arg5[%c0_93, %c0_94] : memref<1x128xf32, #tpu.memory_space<vmem>>, vector<1x128xf32>
      %231 = vector.shape_cast %230 : vector<1x128xf32> to vector<1x1x128xf32>
      %232 = vector.broadcast %231 : vector<1x1x128xf32> to vector<1x8x128xf32>
      %233 = arith.select %229, %232, %227 : vector<1x8x128xi1>, vector<1x8x128xf32>
      %c0_95 = arith.constant 0 : index
      %c0_96 = arith.constant 0 : index
      %234 = vector.load %arg6[%c0_95, %c0_96] : memref<8x128xf32, #tpu.memory_space<vmem>>, vector<8x128xf32>
      %235 = vector.shape_cast %234 : vector<8x128xf32> to vector<1x8x128xf32>
      %236 = arith.addf %233, %235 : vector<1x8x128xf32>
      %237 = arith.mulf %236, %9 : vector<1x8x128xf32>
      %c0_97 = arith.constant 0 : index
      %c0_98 = arith.constant 0 : index
      %c0_99 = arith.constant 0 : index
      %238 = vector.load %arg26[%c0_97, %c0_98, %c0_99] : memref<1x8x128xf32, #tpu.memory_space<vmem>>, vector<1x8x128xf32>
      tpu.vector_store %arg26[%c0_97, %c0_98, %c0_99], %237 {strides = array<i32>} : memref<1x8x128xf32, #tpu.memory_space<vmem>>, vector<1x8x128xf32>,
    } else {
    }
    %c0 = arith.constant 0 : index
    %c0_1 = arith.constant 0 : index
    %c0_2 = arith.constant 0 : index
    %13 = vector.load %arg26[%c0, %c0_1, %c0_2] : memref<1x8x128xf32, #tpu.memory_space<vmem>>, vector<1x8x128xf32>
    %c0_3 = arith.constant 0 : index
    %c0_4 = arith.constant 0 : index
    %c0_5 = arith.constant 0 : index
    %14 = vector.load %arg7[%c0_3, %c0_4, %c0_5] : memref<1x1x128xf32, #tpu.memory_space<vmem>>, vector<1x1x128xf32>
    %15 = vector.shape_cast %14 : vector<1x1x128xf32> to vector<1x128xf32>
    %c0_6 = arith.constant 0 : index
    %c0_7 = arith.constant 0 : index
    %c0_8 = arith.constant 0 : index
    %16 = vector.load %arg8[%c0_6, %c0_7, %c0_8] : memref<1x1x128xf32, #tpu.memory_space<vmem>>, vector<1x1x128xf32>
    %17 = vector.shape_cast %16 : vector<1x1x128xf32> to vector<1x128xf32>
    %cst = arith.constant dense<0.000000e+00> : vector<1x8xf32>
    %18 = vector.multi_reduction <add>, %13, %cst [2] : vector<1x8x128xf32> to vector<1x8xf32>
    %19 = vector.shape_cast %18 : vector<1x8xf32> to vector<1x8x1xf32>
    %cst_9 = arith.constant 3.125000e-02 : f32
    %20 = vector.broadcast %cst_9 : f32 to vector<1x8x1xf32>
    %21 = arith.mulf %19, %20 : vector<1x8x1xf32>
    %22 = vector.broadcast %21 : vector<1x8x1xf32> to vector<1x8x128xf32>
    %23 = arith.subf %13, %22 : vector<1x8x128xf32>
    %24 = arith.mulf %23, %4 : vector<1x8x128xf32>
    %25 = arith.mulf %24, %24 : vector<1x8x128xf32>
    %cst_10 = arith.constant dense<0.000000e+00> : vector<1x8xf32>
    %26 = vector.multi_reduction <add>, %25, %cst_10 [2] : vector<1x8x128xf32> to vector<1x8xf32>
    %27 = vector.shape_cast %26 : vector<1x8xf32> to vector<1x8x1xf32>
    %cst_11 = arith.constant 3.125000e-02 : f32
    %28 = vector.broadcast %cst_11 : f32 to vector<1x8x1xf32>
    %29 = arith.mulf %27, %28 : vector<1x8x1xf32>
    %cst_12 = arith.constant 9.99999997E-7 : f32
    %30 = vector.broadcast %cst_12 : f32 to vector<1x8x1xf32>
    %31 = arith.addf %29, %30 : vector<1x8x1xf32>
    %32 = math.rsqrt %31 : vector<1x8x1xf32>
    %33 = vector.broadcast %32 : vector<1x8x1xf32> to vector<1x8x128xf32>
    %34 = arith.mulf %24, %33 : vector<1x8x128xf32>
    %35 = vector.shape_cast %15 : vector<1x128xf32> to vector<1x1x128xf32>
    %36 = vector.broadcast %35 : vector<1x1x128xf32> to vector<1x8x128xf32>
    %37 = arith.mulf %34, %36 : vector<1x8x128xf32>
    %38 = vector.shape_cast %17 : vector<1x128xf32> to vector<1x1x128xf32>
    %39 = vector.broadcast %38 : vector<1x1x128xf32> to vector<1x8x128xf32>
    %40 = arith.addf %37, %39 : vector<1x8x128xf32>
    %41 = vector.shape_cast %40 : vector<1x8x128xf32> to vector<8x128xf32>
    %42 = arith.truncf %41 : vector<8x128xf32> to vector<8x128xbf16>
    %c0_13 = arith.constant 0 : index
    %c0_14 = arith.constant 0 : index
    %c0_15 = arith.constant 0 : index
    %43 = vector.load %arg9[%c0_13, %c0_14, %c0_15] : memref<1x128x128xbf16, #tpu.memory_space<vmem>>, vector<1x128x128xbf16>
    %44 = vector.shape_cast %43 : vector<1x128x128xbf16> to vector<128x128xbf16>
    %cst_16 = arith.constant dense<0.000000e+00> : vector<8x128xf32>
    %45 = tpu.matmul %42, %44, %cst_16 {dimension_numbers = #tpu.dot_dimension_numbers<[1], [0], [0], [1], [0, 0, 1, 1], [], []>} : vector<8x128xbf16>, vector<128x128xbf16>, vector<8x128xf32> -> vector<8x128xf32>
    %c0_17 = arith.constant 0 : index
    %c0_18 = arith.constant 0 : index
    %c0_19 = arith.constant 0 : index
    %46 = vector.load %arg10[%c0_17, %c0_18, %c0_19] : memref<1x1x128xf32, #tpu.memory_space<vmem>>, vector<1x1x128xf32>
    %47 = vector.shape_cast %46 : vector<1x1x128xf32> to vector<1x128xf32>
    %48 = vector.broadcast %47 : vector<1x128xf32> to vector<8x128xf32>
    %49 = arith.addf %45, %48 : vector<8x128xf32>
    %50 = vector.shape_cast %49 : vector<8x128xf32> to vector<1x8x128xf32>
    %51 = tpu.iota {dimensions = array<i32: 2>} : vector<1x8x8xi32>
    %c5_i32_20 = arith.constant 5 : i32
    %52 = vector.broadcast %c5_i32_20 : i32 to vector<1x8x8xi32>
    %53 = arith.cmpi slt, %51, %52 : vector<1x8x8xi32>
    %54 = vector.extract_strided_slice %50 {offsets = [0, 0, 0], sizes = [1, 8, 8], strides = [1, 1, 1]} : vector<1x8x128xf32> to vector<1x8x8xf32>
    %55 = arith.truncf %54 : vector<1x8x8xf32> to vector<1x8x8xbf16>
    %56 = vector.extract_strided_slice %50 {offsets = [0, 0, 32], sizes = [1, 8, 8], strides = [1, 1, 1]} : vector<1x8x128xf32> to vector<1x8x8xf32>
    %57 = arith.truncf %56 : vector<1x8x8xf32> to vector<1x8x8xbf16>
    %58 = vector.extract_strided_slice %50 {offsets = [0, 0, 64], sizes = [1, 8, 8], strides = [1, 1, 1]} : vector<1x8x128xf32> to vector<1x8x8xf32>
    %59 = arith.truncf %58 : vector<1x8x8xf32> to vector<1x8x8xbf16>
    "tpu.trace_start"() <{level = 10 : i32, message = "bqd,bkd->bqk"}> : () -> ()
    %cst_21 = arith.constant dense<0.000000e+00> : vector<1x8x8xf32>
    %60 = tpu.matmul %55, %57, %cst_21 {dimension_numbers = #tpu.dot_dimension_numbers<[2], [2], [1], [1], [0, 0, 0, 1, 1, 1], [0], [0]>} : vector<1x8x8xbf16>, vector<1x8x8xbf16>, vector<1x8x8xf32> -> vector<1x8x8xf32>
    "tpu.trace_stop"() : () -> ()
    %cst_22 = arith.constant 0.353553385 : f32
    %61 = vector.broadcast %cst_22 : f32 to vector<1x8x8xf32>
    %62 = arith.mulf %60, %61 : vector<1x8x8xf32>
    %cst_23 = arith.constant -1.000000e+30 : f32
    %63 = vector.broadcast %cst_23 : f32 to vector<1x8x8xf32>
    %64 = arith.select %53, %62, %63 : vector<1x8x8xi1>, vector<1x8x8xf32>
    %cst_24 = arith.constant dense<0xFF800000> : vector<1x8xf32>
    %65 = vector.multi_reduction <maximumf>, %64, %cst_24 [2] : vector<1x8x8xf32> to vector<1x8xf32>
    %66 = vector.shape_cast %65 : vector<1x8xf32> to vector<1x8x1xf32>
    %67 = vector.broadcast %66 : vector<1x8x1xf32> to vector<1x8x8xf32>
    %68 = arith.subf %64, %67 : vector<1x8x8xf32>
    %69 = math.exp %68 : vector<1x8x8xf32>
    %cst_25 = arith.constant dense<0.000000e+00> : vector<1x8xf32>
    %70 = vector.multi_reduction <add>, %69, %cst_25 [2] : vector<1x8x8xf32> to vector<1x8xf32>
    %71 = vector.shape_cast %70 : vector<1x8xf32> to vector<1x8x1xf32>
    %72 = tpu.reciprocal %71 {approx = true} : vector<1x8x1xf32> -> vector<1x8x1xf32>
    %73 = vector.broadcast %72 : vector<1x8x1xf32> to vector<1x8x8xf32>
    %74 = arith.mulf %69, %73 : vector<1x8x8xf32>
    %75 = arith.truncf %74 : vector<1x8x8xf32> to vector<1x8x8xbf16>
    "tpu.trace_start"() <{level = 10 : i32, message = "bqk,bkd->bqd"}> : () -> ()
    %cst_26 = arith.constant dense<0.000000e+00> : vector<1x8x8xf32>
    %76 = tpu.matmul %75, %59, %cst_26 {dimension_numbers = #tpu.dot_dimension_numbers<[2], [1], [1], [2], [0, 0, 0, 1, 1, 2], [0], [0]>} : vector<1x8x8xbf16>, vector<1x8x8xbf16>, vector<1x8x8xf32> -> vector<1x8x8xf32>
    "tpu.trace_stop"() : () -> ()
    %77 = vector.extract_strided_slice %50 {offsets = [0, 0, 8], sizes = [1, 8, 8], strides = [1, 1, 1]} : vector<1x8x128xf32> to vector<1x8x8xf32>
    %78 = arith.truncf %77 : vector<1x8x8xf32> to vector<1x8x8xbf16>
    %79 = vector.extract_strided_slice %50 {offsets = [0, 0, 40], sizes = [1, 8, 8], strides = [1, 1, 1]} : vector<1x8x128xf32> to vector<1x8x8xf32>
    %80 = arith.truncf %79 : vector<1x8x8xf32> to vector<1x8x8xbf16>
    %81 = vector.extract_strided_slice %50 {offsets = [0, 0, 72], sizes = [1, 8, 8], strides = [1, 1, 1]} : vector<1x8x128xf32> to vector<1x8x8xf32>
    %82 = arith.truncf %81 : vector<1x8x8xf32> to vector<1x8x8xbf16>
    "tpu.trace_start"() <{level = 10 : i32, message = "bqd,bkd->bqk"}> : () -> ()
    %cst_27 = arith.constant dense<0.000000e+00> : vector<1x8x8xf32>
    %83 = tpu.matmul %78, %80, %cst_27 {dimension_numbers = #tpu.dot_dimension_numbers<[2], [2], [1], [1], [0, 0, 0, 1, 1, 1], [0], [0]>} : vector<1x8x8xbf16>, vector<1x8x8xbf16>, vector<1x8x8xf32> -> vector<1x8x8xf32>
    "tpu.trace_stop"() : () -> ()
    %cst_28 = arith.constant 0.353553385 : f32
    %84 = vector.broadcast %cst_28 : f32 to vector<1x8x8xf32>
    %85 = arith.mulf %83, %84 : vector<1x8x8xf32>
    %cst_29 = arith.constant -1.000000e+30 : f32
    %86 = vector.broadcast %cst_29 : f32 to vector<1x8x8xf32>
    %87 = arith.select %53, %85, %86 : vector<1x8x8xi1>, vector<1x8x8xf32>
    %cst_30 = arith.constant dense<0xFF800000> : vector<1x8xf32>
    %88 = vector.multi_reduction <maximumf>, %87, %cst_30 [2] : vector<1x8x8xf32> to vector<1x8xf32>
    %89 = vector.shape_cast %88 : vector<1x8xf32> to vector<1x8x1xf32>
    %90 = vector.broadcast %89 : vector<1x8x1xf32> to vector<1x8x8xf32>
    %91 = arith.subf %87, %90 : vector<1x8x8xf32>
    %92 = math.exp %91 : vector<1x8x8xf32>
    %cst_31 = arith.constant dense<0.000000e+00> : vector<1x8xf32>
    %93 = vector.multi_reduction <add>, %92, %cst_31 [2] : vector<1x8x8xf32> to vector<1x8xf32>
    %94 = vector.shape_cast %93 : vector<1x8xf32> to vector<1x8x1xf32>
    %95 = tpu.reciprocal %94 {approx = true} : vector<1x8x1xf32> -> vector<1x8x1xf32>
    %96 = vector.broadcast %95 : vector<1x8x1xf32> to vector<1x8x8xf32>
    %97 = arith.mulf %92, %96 : vector<1x8x8xf32>
    %98 = arith.truncf %97 : vector<1x8x8xf32> to vector<1x8x8xbf16>
    "tpu.trace_start"() <{level = 10 : i32, message = "bqk,bkd->bqd"}> : () -> ()
    %cst_32 = arith.constant dense<0.000000e+00> : vector<1x8x8xf32>
    %99 = tpu.matmul %98, %82, %cst_32 {dimension_numbers = #tpu.dot_dimension_numbers<[2], [1], [1], [2], [0, 0, 0, 1, 1, 2], [0], [0]>} : vector<1x8x8xbf16>, vector<1x8x8xbf16>, vector<1x8x8xf32> -> vector<1x8x8xf32>
    "tpu.trace_stop"() : () -> ()
    %100 = vector.extract_strided_slice %50 {offsets = [0, 0, 16], sizes = [1, 8, 8], strides = [1, 1, 1]} : vector<1x8x128xf32> to vector<1x8x8xf32>
    %101 = arith.truncf %100 : vector<1x8x8xf32> to vector<1x8x8xbf16>
    %102 = vector.extract_strided_slice %50 {offsets = [0, 0, 48], sizes = [1, 8, 8], strides = [1, 1, 1]} : vector<1x8x128xf32> to vector<1x8x8xf32>
    %103 = arith.truncf %102 : vector<1x8x8xf32> to vector<1x8x8xbf16>
    %104 = vector.extract_strided_slice %50 {offsets = [0, 0, 80], sizes = [1, 8, 8], strides = [1, 1, 1]} : vector<1x8x128xf32> to vector<1x8x8xf32>
    %105 = arith.truncf %104 : vector<1x8x8xf32> to vector<1x8x8xbf16>
    "tpu.trace_start"() <{level = 10 : i32, message = "bqd,bkd->bqk"}> : () -> ()
    %cst_33 = arith.constant dense<0.000000e+00> : vector<1x8x8xf32>
    %106 = tpu.matmul %101, %103, %cst_33 {dimension_numbers = #tpu.dot_dimension_numbers<[2], [2], [1], [1], [0, 0, 0, 1, 1, 1], [0], [0]>} : vector<1x8x8xbf16>, vector<1x8x8xbf16>, vector<1x8x8xf32> -> vector<1x8x8xf32>
    "tpu.trace_stop"() : () -> ()
    %cst_34 = arith.constant 0.353553385 : f32
    %107 = vector.broadcast %cst_34 : f32 to vector<1x8x8xf32>
    %108 = arith.mulf %106, %107 : vector<1x8x8xf32>
    %cst_35 = arith.constant -1.000000e+30 : f32
    %109 = vector.broadcast %cst_35 : f32 to vector<1x8x8xf32>
    %110 = arith.select %53, %108, %109 : vector<1x8x8xi1>, vector<1x8x8xf32>
    %cst_36 = arith.constant dense<0xFF800000> : vector<1x8xf32>
    %111 = vector.multi_reduction <maximumf>, %110, %cst_36 [2] : vector<1x8x8xf32> to vector<1x8xf32>
    %112 = vector.shape_cast %111 : vector<1x8xf32> to vector<1x8x1xf32>
    %113 = vector.broadcast %112 : vector<1x8x1xf32> to vector<1x8x8xf32>
    %114 = arith.subf %110, %113 : vector<1x8x8xf32>
    %115 = math.exp %114 : vector<1x8x8xf32>
    %cst_37 = arith.constant dense<0.000000e+00> : vector<1x8xf32>
    %116 = vector.multi_reduction <add>, %115, %cst_37 [2] : vector<1x8x8xf32> to vector<1x8xf32>
    %117 = vector.shape_cast %116 : vector<1x8xf32> to vector<1x8x1xf32>
    %118 = tpu.reciprocal %117 {approx = true} : vector<1x8x1xf32> -> vector<1x8x1xf32>
    %119 = vector.broadcast %118 : vector<1x8x1xf32> to vector<1x8x8xf32>
    %120 = arith.mulf %115, %119 : vector<1x8x8xf32>
    %121 = arith.truncf %120 : vector<1x8x8xf32> to vector<1x8x8xbf16>
    "tpu.trace_start"() <{level = 10 : i32, message = "bqk,bkd->bqd"}> : () -> ()
    %cst_38 = arith.constant dense<0.000000e+00> : vector<1x8x8xf32>
    %122 = tpu.matmul %121, %105, %cst_38 {dimension_numbers = #tpu.dot_dimension_numbers<[2], [1], [1], [2], [0, 0, 0, 1, 1, 2], [0], [0]>} : vector<1x8x8xbf16>, vector<1x8x8xbf16>, vector<1x8x8xf32> -> vector<1x8x8xf32>
    "tpu.trace_stop"() : () -> ()
    %123 = vector.extract_strided_slice %50 {offsets = [0, 0, 24], sizes = [1, 8, 8], strides = [1, 1, 1]} : vector<1x8x128xf32> to vector<1x8x8xf32>
    %124 = arith.truncf %123 : vector<1x8x8xf32> to vector<1x8x8xbf16>
    %125 = vector.extract_strided_slice %50 {offsets = [0, 0, 56], sizes = [1, 8, 8], strides = [1, 1, 1]} : vector<1x8x128xf32> to vector<1x8x8xf32>
    %126 = arith.truncf %125 : vector<1x8x8xf32> to vector<1x8x8xbf16>
    %127 = vector.extract_strided_slice %50 {offsets = [0, 0, 88], sizes = [1, 8, 8], strides = [1, 1, 1]} : vector<1x8x128xf32> to vector<1x8x8xf32>
    %128 = arith.truncf %127 : vector<1x8x8xf32> to vector<1x8x8xbf16>
    "tpu.trace_start"() <{level = 10 : i32, message = "bqd,bkd->bqk"}> : () -> ()
    %cst_39 = arith.constant dense<0.000000e+00> : vector<1x8x8xf32>
    %129 = tpu.matmul %124, %126, %cst_39 {dimension_numbers = #tpu.dot_dimension_numbers<[2], [2], [1], [1], [0, 0, 0, 1, 1, 1], [0], [0]>} : vector<1x8x8xbf16>, vector<1x8x8xbf16>, vector<1x8x8xf32> -> vector<1x8x8xf32>
    "tpu.trace_stop"() : () -> ()
    %cst_40 = arith.constant 0.353553385 : f32
    %130 = vector.broadcast %cst_40 : f32 to vector<1x8x8xf32>
    %131 = arith.mulf %129, %130 : vector<1x8x8xf32>
    %cst_41 = arith.constant -1.000000e+30 : f32
    %132 = vector.broadcast %cst_41 : f32 to vector<1x8x8xf32>
    %133 = arith.select %53, %131, %132 : vector<1x8x8xi1>, vector<1x8x8xf32>
    %cst_42 = arith.constant dense<0xFF800000> : vector<1x8xf32>
    %134 = vector.multi_reduction <maximumf>, %133, %cst_42 [2] : vector<1x8x8xf32> to vector<1x8xf32>
    %135 = vector.shape_cast %134 : vector<1x8xf32> to vector<1x8x1xf32>
    %136 = vector.broadcast %135 : vector<1x8x1xf32> to vector<1x8x8xf32>
    %137 = arith.subf %133, %136 : vector<1x8x8xf32>
    %138 = math.exp %137 : vector<1x8x8xf32>
    %cst_43 = arith.constant dense<0.000000e+00> : vector<1x8xf32>
    %139 = vector.multi_reduction <add>, %138, %cst_43 [2] : vector<1x8x8xf32> to vector<1x8xf32>
    %140 = vector.shape_cast %139 : vector<1x8xf32> to vector<1x8x1xf32>
    %141 = tpu.reciprocal %140 {approx = true} : vector<1x8x1xf32> -> vector<1x8x1xf32>
    %142 = vector.broadcast %141 : vector<1x8x1xf32> to vector<1x8x8xf32>
    %143 = arith.mulf %138, %142 : vector<1x8x8xf32>
    %144 = arith.truncf %143 : vector<1x8x8xf32> to vector<1x8x8xbf16>
    "tpu.trace_start"() <{level = 10 : i32, message = "bqk,bkd->bqd"}> : () -> ()
    %cst_44 = arith.constant dense<0.000000e+00> : vector<1x8x8xf32>
    %145 = tpu.matmul %144, %128, %cst_44 {dimension_numbers = #tpu.dot_dimension_numbers<[2], [1], [1], [2], [0, 0, 0, 1, 1, 2], [0], [0]>} : vector<1x8x8xbf16>, vector<1x8x8xbf16>, vector<1x8x8xf32> -> vector<1x8x8xf32>
    "tpu.trace_stop"() : () -> ()
    %146 = tpu.concatenate %76, %99, %122, %145 in 2 : vector<1x8x8xf32>, vector<1x8x8xf32>, vector<1x8x8xf32>, vector<1x8x8xf32> -> vector<1x8x32xf32>
    %147 = vector.shape_cast %146 : vector<1x8x32xf32> to vector<8x32xf32>
    %148 = arith.truncf %147 : vector<8x32xf32> to vector<8x32xbf16>
    %c0_45 = arith.constant 0 : index
    %c0_46 = arith.constant 0 : index
    %c0_47 = arith.constant 0 : index
    %149 = vector.load %arg11[%c0_45, %c0_46, %c0_47] : memref<1x32x128xbf16, #tpu.memory_space<vmem>>, vector<1x32x128xbf16>
    %150 = vector.shape_cast %149 : vector<1x32x128xbf16> to vector<32x128xbf16>
    %cst_48 = arith.constant dense<0.000000e+00> : vector<8x128xf32>
    %151 = tpu.matmul %148, %150, %cst_48 {dimension_numbers = #tpu.dot_dimension_numbers<[1], [0], [0], [1], [0, 0, 1, 1], [], []>} : vector<8x32xbf16>, vector<32x128xbf16>, vector<8x128xf32> -> vector<8x128xf32>
    %152 = vector.shape_cast %151 : vector<8x128xf32> to vector<1x8x128xf32>
    %153 = arith.addf %13, %152 : vector<1x8x128xf32>
    %c0_49 = arith.constant 0 : index
    %c0_50 = arith.constant 0 : index
    %c0_51 = arith.constant 0 : index
    %154 = vector.load %arg12[%c0_49, %c0_50, %c0_51] : memref<1x1x128xf32, #tpu.memory_space<vmem>>, vector<1x1x128xf32>
    %155 = vector.shape_cast %154 : vector<1x1x128xf32> to vector<1x128xf32>
    %156 = vector.shape_cast %155 : vector<1x128xf32> to vector<1x1x128xf32>
    %157 = vector.broadcast %156 : vector<1x1x128xf32> to vector<1x8x128xf32>
    %158 = arith.addf %153, %157 : vector<1x8x128xf32>
    %c0_52 = arith.constant 0 : index
    %c0_53 = arith.constant 0 : index
    %c0_54 = arith.constant 0 : index
    %159 = vector.load %arg13[%c0_52, %c0_53, %c0_54] : memref<1x1x128xf32, #tpu.memory_space<vmem>>, vector<1x1x128xf32>
    %160 = vector.shape_cast %159 : vector<1x1x128xf32> to vector<1x128xf32>
    %c0_55 = arith.constant 0 : index
    %c0_56 = arith.constant 0 : index
    %c0_57 = arith.constant 0 : index
    %161 = vector.load %arg14[%c0_55, %c0_56, %c0_57] : memref<1x1x128xf32, #tpu.memory_space<vmem>>, vector<1x1x128xf32>
    %162 = vector.shape_cast %161 : vector<1x1x128xf32> to vector<1x128xf32>
    %cst_58 = arith.constant dense<0.000000e+00> : vector<1x8xf32>
    %163 = vector.multi_reduction <add>, %158, %cst_58 [2] : vector<1x8x128xf32> to vector<1x8xf32>
    %164 = vector.shape_cast %163 : vector<1x8xf32> to vector<1x8x1xf32>
    %cst_59 = arith.constant 3.125000e-02 : f32
    %165 = vector.broadcast %cst_59 : f32 to vector<1x8x1xf32>
    %166 = arith.mulf %164, %165 : vector<1x8x1xf32>
    %167 = vector.broadcast %166 : vector<1x8x1xf32> to vector<1x8x128xf32>
    %168 = arith.subf %158, %167 : vector<1x8x128xf32>
    %169 = arith.mulf %168, %4 : vector<1x8x128xf32>
    %170 = arith.mulf %169, %169 : vector<1x8x128xf32>
    %cst_60 = arith.constant dense<0.000000e+00> : vector<1x8xf32>
    %171 = vector.multi_reduction <add>, %170, %cst_60 [2] : vector<1x8x128xf32> to vector<1x8xf32>
    %172 = vector.shape_cast %171 : vector<1x8xf32> to vector<1x8x1xf32>
    %cst_61 = arith.constant 3.125000e-02 : f32
    %173 = vector.broadcast %cst_61 : f32 to vector<1x8x1xf32>
    %174 = arith.mulf %172, %173 : vector<1x8x1xf32>
    %cst_62 = arith.constant 9.99999997E-7 : f32
    %175 = vector.broadcast %cst_62 : f32 to vector<1x8x1xf32>
    %176 = arith.addf %174, %175 : vector<1x8x1xf32>
    %177 = math.rsqrt %176 : vector<1x8x1xf32>
    %178 = vector.broadcast %177 : vector<1x8x1xf32> to vector<1x8x128xf32>
    %179 = arith.mulf %169, %178 : vector<1x8x128xf32>
    %180 = vector.shape_cast %160 : vector<1x128xf32> to vector<1x1x128xf32>
    %181 = vector.broadcast %180 : vector<1x1x128xf32> to vector<1x8x128xf32>
    %182 = arith.mulf %179, %181 : vector<1x8x128xf32>
    %183 = vector.shape_cast %162 : vector<1x128xf32> to vector<1x1x128xf32>
    %184 = vector.broadcast %183 : vector<1x1x128xf32> to vector<1x8x128xf32>
    %185 = arith.addf %182, %184 : vector<1x8x128xf32>
    %186 = vector.shape_cast %185 : vector<1x8x128xf32> to vector<8x128xf32>
    %187 = arith.truncf %186 : vector<8x128xf32> to vector<8x128xbf16>
    %c0_63 = arith.constant 0 : index
    %c0_64 = arith.constant 0 : index
    %c0_65 = arith.constant 0 : index
    %188 = vector.load %arg15[%c0_63, %c0_64, %c0_65] : memref<1x128x128xbf16, #tpu.memory_space<vmem>>, vector<1x128x128xbf16>
    %189 = vector.shape_cast %188 : vector<1x128x128xbf16> to vector<128x128xbf16>
    %cst_66 = arith.constant dense<0.000000e+00> : vector<8x128xf32>
    %190 = tpu.matmul %187, %189, %cst_66 {dimension_numbers = #tpu.dot_dimension_numbers<[1], [0], [0], [1], [0, 0, 1, 1], [], []>} : vector<8x128xbf16>, vector<128x128xbf16>, vector<8x128xf32> -> vector<8x128xf32>
    %c0_67 = arith.constant 0 : index
    %c0_68 = arith.constant 0 : index
    %c0_69 = arith.constant 0 : index
    %191 = vector.load %arg16[%c0_67, %c0_68, %c0_69] : memref<1x1x128xf32, #tpu.memory_space<vmem>>, vector<1x1x128xf32>
    %192 = vector.shape_cast %191 : vector<1x1x128xf32> to vector<1x128xf32>
    %193 = vector.broadcast %192 : vector<1x128xf32> to vector<8x128xf32>
    %194 = arith.addf %190, %193 : vector<8x128xf32>
    %cst_70 = arith.constant 5.000000e-01 : f32
    %195 = vector.broadcast %cst_70 : f32 to vector<8x128xf32>
    %196 = arith.mulf %195, %194 : vector<8x128xf32>
    %cst_71 = arith.constant 0.707106769 : f32
    %197 = vector.broadcast %cst_71 : f32 to vector<8x128xf32>
    %198 = arith.mulf %194, %197 : vector<8x128xf32>
    %199 = math.erf %198 : vector<8x128xf32>
    %cst_72 = arith.constant 1.000000e+00 : f32
    %200 = vector.broadcast %cst_72 : f32 to vector<8x128xf32>
    %201 = arith.addf %200, %199 : vector<8x128xf32>
    %202 = arith.mulf %196, %201 : vector<8x128xf32>
    %203 = arith.truncf %202 : vector<8x128xf32> to vector<8x128xbf16>
    %c0_73 = arith.constant 0 : index
    %c0_74 = arith.constant 0 : index
    %c0_75 = arith.constant 0 : index
    %204 = vector.load %arg17[%c0_73, %c0_74, %c0_75] : memref<1x128x128xbf16, #tpu.memory_space<vmem>>, vector<1x128x128xbf16>
    %205 = vector.shape_cast %204 : vector<1x128x128xbf16> to vector<128x128xbf16>
    %cst_76 = arith.constant dense<0.000000e+00> : vector<8x128xf32>
    %206 = tpu.matmul %203, %205, %cst_76 {dimension_numbers = #tpu.dot_dimension_numbers<[1], [0], [0], [1], [0, 0, 1, 1], [], []>} : vector<8x128xbf16>, vector<128x128xbf16>, vector<8x128xf32> -> vector<8x128xf32>
    %c0_77 = arith.constant 0 : index
    %c0_78 = arith.constant 0 : index
    %c0_79 = arith.constant 0 : index
    %207 = vector.load %arg18[%c0_77, %c0_78, %c0_79] : memref<1x1x128xf32, #tpu.memory_space<vmem>>, vector<1x1x128xf32>
    %208 = vector.shape_cast %207 : vector<1x1x128xf32> to vector<1x128xf32>
    %209 = vector.broadcast %208 : vector<1x128xf32> to vector<8x128xf32>
    %210 = arith.addf %206, %209 : vector<8x128xf32>
    %211 = vector.shape_cast %210 : vector<8x128xf32> to vector<1x8x128xf32>
    %212 = arith.addf %158, %211 : vector<1x8x128xf32>
    %213 = arith.mulf %212, %9 : vector<1x8x128xf32>
    %c0_80 = arith.constant 0 : index
    %c0_81 = arith.constant 0 : index
    %c0_82 = arith.constant 0 : index
    %214 = vector.load %arg26[%c0_80, %c0_81, %c0_82] : memref<1x8x128xf32, #tpu.memory_space<vmem>>, vector<1x8x128xf32>
    tpu.vector_store %arg26[%c0_80, %c0_81, %c0_82], %213 {strides = array<i32>} : memref<1x8x128xf32, #tpu.memory_space<vmem>>, vector<1x8x128xf32>,
    %c1_i32 = arith.constant 1 : i32
    %215 = arith.cmpi eq, %arg1, %c1_i32 : i32
    %216 = arith.extui %215 : i1 to i32
    %c0_i32_83 = arith.constant 0 : i32
    %217 = arith.cmpi ne, %216, %c0_i32_83 : i32
    scf.if %217 {
      %218 = vector.extract_strided_slice %213 {offsets = [0, 0, 0], sizes = [1, 1, 128], strides = [1, 1, 1]} : vector<1x8x128xf32> to vector<1x1x128xf32>
      %219 = vector.shape_cast %218 : vector<1x1x128xf32> to vector<1x128xf32>
      %220 = tpu.iota {dimensions = array<i32: 1>} : vector<1x128xi32>
      %c32_i32_84 = arith.constant 32 : i32
      %221 = vector.broadcast %c32_i32_84 : i32 to vector<1x128xi32>
      %222 = arith.cmpi slt, %220, %221 : vector<1x128xi32>
      %223 = arith.extui %222 : vector<1x128xi1> to vector<1x128xi32>
      %224 = arith.sitofp %223 : vector<1x128xi32> to vector<1x128xf32>
      %cst_85 = arith.constant dense<0.000000e+00> : vector<1xf32>
      %225 = vector.multi_reduction <add>, %219, %cst_85 [1] : vector<1x128xf32> to vector<1xf32>
      %226 = vector.shape_cast %225 : vector<1xf32> to vector<1x1xf32>
      %cst_86 = arith.constant 3.125000e-02 : f32
      %227 = vector.broadcast %cst_86 : f32 to vector<1x1xf32>
      %228 = arith.mulf %226, %227 : vector<1x1xf32>
      %229 = vector.broadcast %228 : vector<1x1xf32> to vector<1x128xf32>
      %230 = arith.subf %219, %229 : vector<1x128xf32>
      %231 = arith.mulf %230, %224 : vector<1x128xf32>
      %232 = arith.mulf %231, %231 : vector<1x128xf32>
      %cst_87 = arith.constant dense<0.000000e+00> : vector<1xf32>
      %233 = vector.multi_reduction <add>, %232, %cst_87 [1] : vector<1x128xf32> to vector<1xf32>
      %234 = vector.shape_cast %233 : vector<1xf32> to vector<1x1xf32>
      %cst_88 = arith.constant 3.125000e-02 : f32
      %235 = vector.broadcast %cst_88 : f32 to vector<1x1xf32>
      %236 = arith.mulf %234, %235 : vector<1x1xf32>
      %cst_89 = arith.constant 9.99999997E-7 : f32
      %237 = vector.broadcast %cst_89 : f32 to vector<1x1xf32>
      %238 = arith.addf %236, %237 : vector<1x1xf32>
      %239 = math.rsqrt %238 : vector<1x1xf32>
      %240 = vector.broadcast %239 : vector<1x1xf32> to vector<1x128xf32>
      %241 = arith.mulf %231, %240 : vector<1x128xf32>
      %c0_90 = arith.constant 0 : index
      %c0_91 = arith.constant 0 : index
      %242 = vector.load %arg19[%c0_90, %c0_91] : memref<1x128xf32, #tpu.memory_space<vmem>>, vector<1x128xf32>
      %243 = arith.mulf %241, %242 : vector<1x128xf32>
      %c0_92 = arith.constant 0 : index
      %c0_93 = arith.constant 0 : index
      %244 = vector.load %arg20[%c0_92, %c0_93] : memref<1x128xf32, #tpu.memory_space<vmem>>, vector<1x128xf32>
      %245 = arith.addf %243, %244 : vector<1x128xf32>
      %c0_94 = arith.constant 0 : index
      %c0_95 = arith.constant 0 : index
      %246 = vector.load %arg23[%c0_94, %c0_95] : memref<1x128xf32, #tpu.memory_space<vmem>>, vector<1x128xf32>
      %247 = arith.subf %245, %246 : vector<1x128xf32>
      %c0_96 = arith.constant 0 : index
      %c0_97 = arith.constant 0 : index
      %248 = vector.load %arg24[%c0_96, %c0_97] : memref<1x128xf32, #tpu.memory_space<vmem>>, vector<1x128xf32>
      %cst_98 = arith.constant 9.99999974E-6 : f32
      %249 = vector.broadcast %cst_98 : f32 to vector<1x128xf32>
      %250 = arith.addf %248, %249 : vector<1x128xf32>
      %251 = math.rsqrt %250 : vector<1x128xf32>
      %252 = arith.mulf %247, %251 : vector<1x128xf32>
      %c0_99 = arith.constant 0 : index
      %c0_100 = arith.constant 0 : index
      %253 = vector.load %arg21[%c0_99, %c0_100] : memref<1x128xf32, #tpu.memory_space<vmem>>, vector<1x128xf32>
      %254 = arith.mulf %252, %253 : vector<1x128xf32>
      %c0_101 = arith.constant 0 : index
      %c0_102 = arith.constant 0 : index
      %255 = vector.load %arg22[%c0_101, %c0_102] : memref<1x128xf32, #tpu.memory_space<vmem>>, vector<1x128xf32>
      %256 = arith.addf %254, %255 : vector<1x128xf32>
      %cst_103 = arith.constant 0.000000e+00 : f32
      %257 = vector.broadcast %cst_103 : f32 to vector<7x128xf32>
      %258 = tpu.concatenate %256, %257 in 0 : vector<1x128xf32>, vector<7x128xf32> -> vector<8x128xf32>
      %c0_104 = arith.constant 0 : index
      %c0_105 = arith.constant 0 : index
      %c0_106 = arith.constant 0 : index
      %259 = vector.load %arg25[%c0_104, %c0_105, %c0_106] : memref<1x8x128xf32, #tpu.memory_space<vmem>>, vector<1x8x128xf32>
      %260 = vector.shape_cast %259 : vector<1x8x128xf32> to vector<8x128xf32>
      %261 = vector.shape_cast %258 : vector<8x128xf32> to vector<1x8x128xf32>
      tpu.vector_store %arg25[%c0_104, %c0_105, %c0_106], %261 {strides = array<i32>} : memref<1x8x128xf32, #tpu.memory_space<vmem>>, vector<1x8x128xf32>,
    } else {
    }
    return
  }
  func.func @transform_0(%arg0: i32, %arg1: i32) -> (i32, i32, i32) {
    %c0_i32 = arith.constant 0 : i32
    %c0_i32_0 = arith.constant 0 : i32
    %c0_i32_1 = arith.constant 0 : i32
    return %arg0, %c0_i32, %c0_i32_0 : i32, i32, i32
  }
  func.func @transform_1(%arg0: i32, %arg1: i32) -> (i32, i32) {
    %c0_i32 = arith.constant 0 : i32
    %c0_i32_0 = arith.constant 0 : i32
    %c0_i32_1 = arith.constant 0 : i32
    return %c0_i32, %c0_i32_0 : i32, i32
  }
  func.func @transform_2(%arg0: i32, %arg1: i32) -> (i32, i32) {
    %c0_i32 = arith.constant 0 : i32
    %c0_i32_0 = arith.constant 0 : i32
    %c0_i32_1 = arith.constant 0 : i32
    return %c0_i32, %c0_i32_0 : i32, i32
  }
  func.func @transform_3(%arg0: i32, %arg1: i32) -> (i32, i32) {
    %c0_i32 = arith.constant 0 : i32
    %c0_i32_0 = arith.constant 0 : i32
    %c0_i32_1 = arith.constant 0 : i32
    return %c0_i32, %c0_i32_0 : i32, i32
  }
  func.func @transform_4(%arg0: i32, %arg1: i32) -> (i32, i32) {
    %c0_i32 = arith.constant 0 : i32
    %c0_i32_0 = arith.constant 0 : i32
    %c0_i32_1 = arith.constant 0 : i32
    return %c0_i32, %c0_i32_0 : i32, i32
  }
  func.func @transform_5(%arg0: i32, %arg1: i32) -> (i32, i32, i32) {
    %c0_i32 = arith.constant 0 : i32
    %c0_i32_0 = arith.constant 0 : i32
    %c0_i32_1 = arith.constant 0 : i32
    return %arg1, %c0_i32, %c0_i32_0 : i32, i32, i32
  }
  func.func @transform_6(%arg0: i32, %arg1: i32) -> (i32, i32, i32) {
    %c0_i32 = arith.constant 0 : i32
    %c0_i32_0 = arith.constant 0 : i32
    %c0_i32_1 = arith.constant 0 : i32
    return %arg1, %c0_i32, %c0_i32_0 : i32, i32, i32
  }
  func.func @transform_7(%arg0: i32, %arg1: i32) -> (i32, i32, i32) {
    %c0_i32 = arith.constant 0 : i32
    %c0_i32_0 = arith.constant 0 : i32
    %c0_i32_1 = arith.constant 0 : i32
    return %arg1, %c0_i32, %c0_i32_0 : i32, i32, i32
  }
  func.func @transform_8(%arg0: i32, %arg1: i32) -> (i32, i32, i32) {
    %c0_i32 = arith.constant 0 : i32
    %c0_i32_0 = arith.constant 0 : i32
    %c0_i32_1 = arith.constant 0 : i32
    return %arg1, %c0_i32, %c0_i32_0 : i32, i32, i32
  }
  func.func @transform_9(%arg0: i32, %arg1: i32) -> (i32, i32, i32) {
    %c0_i32 = arith.constant 0 : i32
    %c0_i32_0 = arith.constant 0 : i32
    %c0_i32_1 = arith.constant 0 : i32
    return %arg1, %c0_i32, %c0_i32_0 : i32, i32, i32
  }
  func.func @transform_10(%arg0: i32, %arg1: i32) -> (i32, i32, i32) {
    %c0_i32 = arith.constant 0 : i32
    %c0_i32_0 = arith.constant 0 : i32
    %c0_i32_1 = arith.constant 0 : i32
    return %arg1, %c0_i32, %c0_i32_0 : i32, i32, i32
  }
  func.func @transform_11(%arg0: i32, %arg1: i32) -> (i32, i32, i32) {
    %c0_i32 = arith.constant 0 : i32
    %c0_i32_0 = arith.constant 0 : i32
    %c0_i32_1 = arith.constant 0 : i32
    return %arg1, %c0_i32, %c0_i32_0 : i32, i32, i32
  }
  func.func @transform_12(%arg0: i32, %arg1: i32) -> (i32, i32, i32) {
    %c0_i32 = arith.constant 0 : i32
    %c0_i32_0 = arith.constant 0 : i32
    %c0_i32_1 = arith.constant 0 : i32
    return %arg1, %c0_i32, %c0_i32_0 : i32, i32, i32
  }
  func.func @transform_13(%arg0: i32, %arg1: i32) -> (i32, i32, i32) {
    %c0_i32 = arith.constant 0 : i32
    %c0_i32_0 = arith.constant 0 : i32
    %c0_i32_1 = arith.constant 0 : i32
    return %arg1, %c0_i32, %c0_i32_0 : i32, i32, i32
  }
  func.func @transform_14(%arg0: i32, %arg1: i32) -> (i32, i32, i32) {
    %c0_i32 = arith.constant 0 : i32
    %c0_i32_0 = arith.constant 0 : i32
    %c0_i32_1 = arith.constant 0 : i32
    return %arg1, %c0_i32, %c0_i32_0 : i32, i32, i32
  }
  func.func @transform_15(%arg0: i32, %arg1: i32) -> (i32, i32, i32) {
    %c0_i32 = arith.constant 0 : i32
    %c0_i32_0 = arith.constant 0 : i32
    %c0_i32_1 = arith.constant 0 : i32
    return %arg1, %c0_i32, %c0_i32_0 : i32, i32, i32
  }
  func.func @transform_16(%arg0: i32, %arg1: i32) -> (i32, i32, i32) {
    %c0_i32 = arith.constant 0 : i32
    %c0_i32_0 = arith.constant 0 : i32
    %c0_i32_1 = arith.constant 0 : i32
    return %arg1, %c0_i32, %c0_i32_0 : i32, i32, i32
  }
  func.func @transform_17(%arg0: i32, %arg1: i32) -> (i32, i32) {
    %c0_i32 = arith.constant 0 : i32
    %c0_i32_0 = arith.constant 0 : i32
    %c0_i32_1 = arith.constant 0 : i32
    return %c0_i32, %c0_i32_0 : i32, i32
  }
  func.func @transform_18(%arg0: i32, %arg1: i32) -> (i32, i32) {
    %c0_i32 = arith.constant 0 : i32
    %c0_i32_0 = arith.constant 0 : i32
    %c0_i32_1 = arith.constant 0 : i32
    return %c0_i32, %c0_i32_0 : i32, i32
  }
  func.func @transform_19(%arg0: i32, %arg1: i32) -> (i32, i32) {
    %c0_i32 = arith.constant 0 : i32
    %c0_i32_0 = arith.constant 0 : i32
    %c0_i32_1 = arith.constant 0 : i32
    return %c0_i32, %c0_i32_0 : i32, i32
  }
  func.func @transform_20(%arg0: i32, %arg1: i32) -> (i32, i32) {
    %c0_i32 = arith.constant 0 : i32
    %c0_i32_0 = arith.constant 0 : i32
    %c0_i32_1 = arith.constant 0 : i32
    return %c0_i32, %c0_i32_0 : i32, i32
  }
  func.func @transform_21(%arg0: i32, %arg1: i32) -> (i32, i32) {
    %c0_i32 = arith.constant 0 : i32
    %c0_i32_0 = arith.constant 0 : i32
    %c0_i32_1 = arith.constant 0 : i32
    return %c0_i32, %c0_i32_0 : i32, i32
  }
  func.func @transform_22(%arg0: i32, %arg1: i32) -> (i32, i32) {
    %c0_i32 = arith.constant 0 : i32
    %c0_i32_0 = arith.constant 0 : i32
    %c0_i32_1 = arith.constant 0 : i32
    return %c0_i32, %c0_i32_0 : i32, i32
  }
  func.func @transform_23(%arg0: i32, %arg1: i32) -> (i32, i32, i32) {
    %c0_i32 = arith.constant 0 : i32
    %c0_i32_0 = arith.constant 0 : i32
    %c0_i32_1 = arith.constant 0 : i32
    return %arg0, %c0_i32, %c0_i32_0 : i32, i32, i32
  }
}

</mosaic_0001>

<bundles_post_ra>
// kernel: vit_forward.1
= control target key start
LH: loop header
LB: loop body
LE: loop exit
PB: predicated region body
PF: predicated region fallthrough
CT: control target
= control target key end

     0   :  { %s2853_s30 = smov 0   ;;  %s2855_s24 = smov 0   ;;  %s3252_s0 = inlined_call_operand.vmem [shape: f32[2,8,256], index: 0, kind: input, shape index: {}]   ;;  %s3253_s1 = inlined_call_operand.vmem [shape: bf16[256,128], index: 1, kind: input, shape index: {}]   ;;  %s3254_s2 = inlined_call_operand.vmem [shape: f32[1,128], index: 2, kind: input, shape index: {}]   ;;  %s3255_s3 = inlined_call_operand.vmem [shape: f32[1,128], index: 3, kind: input, shape index: {}]   ;;  %s3256_s4 = inlined_call_operand.vmem [shape: f32[8,128], index: 4, kind: input, shape index: {}]   ;;  %s3257_s5 = inlined_call_operand.vmem [shape: f32[2,1,128], index: 5, kind: input, shape index: {}]   ;;  %s3258_s6 = inlined_call_operand.vmem [shape: f32[2,1,128], index: 6, kind: input, shape index: {}]   ;;  %s3259_s7 = inlined_call_operand.vmem [shape: bf16[2,128,128], index: 7, kind: input, shape index: {}]   ;;  %s3260_s8 = inlined_call_operand.vmem [shape: f32[2,1,128], index: 8, kind: input, shape index: {}]   ;;  %s3261_s9 = inlined_call_operand.vmem [shape: bf16[2,32,128], index: 9, kind: input, shape index: {}]   ;;  %s3262_s10 = inlined_call_operand.vmem [shape: f32[2,1,128], index: 10, kind: input, shape index: {}]   ;;  %s3263_s11 = inlined_call_operand.vmem [shape: f32[2,1,128], index: 11, kind: input, shape index: {}]   ;;  %s3264_s12 = inlined_call_operand.vmem [shape: f32[2,1,128], index: 12, kind: input, shape index: {}]   ;;  %s3265_s13 = inlined_call_operand.vmem [shape: bf16[2,128,128], index: 13, kind: input, shape index: {}]   ;;  %s3266_s14 = inlined_call_operand.vmem [shape: f32[2,1,128], index: 14, kind: input, shape index: {}]   ;;  %s3267_s15 = inlined_call_operand.vmem [shape: bf16[2,128,128], index: 15, kind: input, shape index: {}]   ;;  %s3268_s16 = inlined_call_operand.vmem [shape: f32[2,1,128], index: 16, kind: input, shape index: {}]   ;;  %s3269_s17 = inlined_call_operand.vmem [shape: f32[1,128], index: 17, kind: input, shape index: {}]   ;;  %s3270_s18 = inlined_call_operand.vmem [shape: f32[1,128], index: 18, kind: input, shape index: {}]   ;;  %s3271_s19 = inlined_call_operand.vmem [shape: f32[1,128], index: 19, kind: input, shape index: {}]   ;;  %s3272_s20 = inlined_call_operand.vmem [shape: f32[1,128], index: 20, kind: input, shape index: {}]   ;;  %s3273_s21 = inlined_call_operand.vmem [shape: f32[1,128], index: 21, kind: input, shape index: {}]   ;;  %s3274_s22 = inlined_call_operand.vmem [shape: f32[1,128], index: 22, kind: input, shape index: {}]   ;;  %s3275_s23 = inlined_call_operand.vmem [shape: f32[2,8,128], index: 23, kind: output, shape index: {}]  }
   0x1   :  { %3281 = sst [smem:[#allocation9_spill]] %s3252_s0  ;;  %s2857_s25 = smov 0  }
   0x2   :  { %3282 = sst [smem:[#allocation10_spill]] %s3253_s1 }
   0x3   :  { %3283 = sst [smem:[#allocation11_spill]] %s3254_s2 }
   0x4   :  { %3284 = sst [smem:[#allocation12_spill]] %s3255_s3 }
   0x5   :  { %3285 = sst [smem:[#allocation13_spill]] %s3256_s4  ;;  %s2851_s4 = smov 0  }
   0x6   :  { %3286 = sst [smem:[#allocation14_spill]] %s3257_s5  ;;  %s2859_s5 = smov 0  }
   0x7   :  { %3287 = sst [smem:[#allocation15_spill]] %s3258_s6 }
   0x8   :  { %3288 = sst [smem:[#allocation16_spill]] %s3259_s7 }
   0x9   :  { %3289 = sst [smem:[#allocation17_spill]] %s3269_s17 }
   0xa   :  { %3290 = sst [smem:[#allocation18_spill]] %s3270_s18 }
   0xb   :  { %3291 = sst [smem:[#allocation19_spill]] %s3271_s19 }
   0xc   :  { %3292 = sst [smem:[#allocation20_spill]] %s3272_s20 }
   0xd   :  { %3293 = sst [smem:[#allocation21_spill]] %s3273_s21 }
   0xe   :  { %3294 = sst [smem:[#allocation22_spill]] %s3274_s22 }
   0xf LB: > { %3295 = sst [smem:[#allocation3_spill]] %s2705_s24  ;;  %s42_s1 = sadd.s32 1, %s2705_s24  ;;  %s2713_s5 = sphi %s2859_s5, %s33_s5   ;;  %s2709_s25 = sphi %s2857_s25, %s3328_s25   ;;  %s2705_s24 = sphi %s2855_s24, %s3327_s24   ;;  %s2701_s30 = sphi %s2853_s30, %s3326_s30   ;;  %s2697_s4 = sphi %s2851_s4, %s3325_s4  }
  0x10   : > { %3296 = sst [smem:[#allocation4_spill]] %s2709_s25  ;;  %s45_s26 = sadd.s32 1, %s2709_s25 }
  0x11   : > { %3297 = sst [smem:[#allocation5_spill]] %s2713_s5  ;;  %p43_p0 = scmp.ge.s32.totalorder %s42_s1, 2 }
  0x12   : > { %p2283_p1 = scmp.ge.s32.totalorder %s2713_s5, 1  ;;  %p753_p2 = scmp.lt.s32.totalorder %s2713_s5, 5 }
  0x13   : > { %s3330_s1 = smov (%p43_p0, %s42_s1), 0  ;;  %s3332_s26 = smov (!%p43_p0, %s45_s26), %s2709_s25 }
  0x14   : > { %3298 = sst [smem:[#allocation6_spill]] %s3330_s1  ;;  %p754_p3 = pnand %p2283_p1, %p753_p2 }
  0x15   : > { %p47_p4 = scmp.ge.s32.totalorder %s3332_s26, 2 }
  0x16   : > { %757 = sbr.rel (%p754_p3) target bundleno = 3517 (0xdbd), region = 112 }
  0x17   : > { %s3334_s26 = smov (%p47_p4, %s3332_s26), 0 }
  0x18   : > { %3299 = sst [smem:[#allocation7_spill]] %s3334_s26 }
  0x1b   : > { %p860_p5 = scmp.lt.s32.totalorder %s2701_s30, 1  ;;  %p865_p6 = scmp.lt.s32.totalorder %s2697_s4, 1  ;;  %v914_v0 = vlaneseq  ;;  %v2715_v3 = vmov 0.0  }
  0x1c   : > { %s3300_s29 = sld [smem:[#allocation9_spill]]  ;;  %p2297_p7 = scmp.ne.s32.totalorder %s2697_s4, 0 }
  0x1d   : > { %s3336_s30 = smov (!%p860_p5, %s2701_s30), 1  ;;  %v2884_v1 = vand.u32 127, %v914_v0  ;;  %v2886_v2 = vshrl.u32 %v914_v0, 7  ;;  %s3305_s18 = sld [smem:[#allocation10_spill]] (!%p2297_p7) }
  0x1e   : > { %s2889_s2 = scalar_select %p865_p6, %s2697_s4, 1 }
  0x1f   : > { %s2362_s6 = sshll.u32 %s3336_s30, 4  ;;  %s2294_s27 = sshll.u32 %s3336_s30, 3  ;;  %vm916_vm0 = vcmp.lt.s32.totalorder %v2884_v1, 32  ;;  %vm921_vm1 = vcmp.lt.s32.totalorder %v2886_v2, 5 }
  0x20   : > { %v2903_v4 = vsel %vm916_vm0, 1.0, %v2715_v3  ;;  %v2906_v5 = vsel %vm921_vm1, 1.0, %v2715_v3  ;;  %s2363_s7 = sshll.u32 %s2889_s2, 6  ;;  %s2364_s25 = sshll.u32 %s2889_s2, 4 }
  0x21   : > { %s2930_s24 = scalar_lea.vmem %s3261_s9, %s2364_s25  ;;  %s2943_s0 = scalar_lea.vmem %s3265_s13, %s2363_s7 }
  0x22   : > { %s2896_s3 = scalar_lea.vmem %s3300_s29, %s2362_s6  ;;  %s3304_s29 = sld [smem:[#allocation16_spill]] }
  0x23   : > { %3301 = sst [smem:[#allocation8_spill]] %s2896_s3  ;;  %s900_s17 = scalar_lea.vmem %s3266_s14, %s2889_s2 }
  0x24   : > { %s2952_s3 = scalar_lea.vmem %s3267_s15, %s2363_s7  ;;  %s908_s28 = scalar_lea.vmem %s3268_s16, %s2889_s2 }
  0x25   : > { %s2961_s20 = scalar_lea.vmem %s3275_s23, %s2294_s27  ;;  %927 = sbr.rel (%p2297_p7) target bundleno = 280 (0x118), region = 116 }
  0x26   : > { %s3306_s30 = sld [smem:[#allocation8_spill]] (!%p2297_p7) }
  0x27   : > { %s3308_s27 = sld [smem:[#allocation12_spill]] (!%p2297_p7) }
  0x28   : > { %s2916_s19 = scalar_lea.vmem %s3304_s29, %s2363_s7  ;;  %s3307_s7 = sld [smem:[#allocation11_spill]] (!%p2297_p7) }
  0x29   : > { %s3309_s29 = sld [smem:[#allocation13_spill]] (!%p2297_p7) }
  0x2a   : > { %v2607_v6 = vld [vmem:[%s3305_s18 + $0x78] sm:$0xff]   ;;  %v2609_v8 = vld [vmem:[%s3305_s18 + $0x70] sm:$0xff]   ;;  %v2611_v10 = vld [vmem:[%s3305_s18 + $0x68] sm:$0xff]   ;;  %vm1108_vm2 = vcmp.eq.s32.totalorder %v2886_v2, 0 }
  0x2b   : > { %v2608_v7 = vld [vmem:[%s3305_s18 + $0x38] sm:$0xff]   ;;  %2367 = vmatprep.subr.bf16.mxu0 %v2607_v6  ;;  %v2610_v9 = vld [vmem:[%s3305_s18 + $0x30] sm:$0xff]   ;;  %v2612_v11 = vld [vmem:[%s3305_s18 + $0x28] sm:$0xff]  }
  0x2c   : > { %2368 = vmatpush3.bf16.msra.mxu0 %v2608_v7  ;;  %v2613_v12 = vld [vmem:[%s3305_s18 + $0x60] sm:$0xff]   ;;  %v2615_v14 = vld [vmem:[%s3305_s18 + $0x58] sm:$0xff]   ;;  %v2617_v16 = vld [vmem:[%s3305_s18 + $0x50] sm:$0xff]  }
  0x2d   : > { %2369 = vmatprep.subr.bf16.mxu0 %v2609_v8  ;;  %v2614_v13 = vld [vmem:[%s3305_s18 + $0x20] sm:$0xff]   ;;  %v2616_v15 = vld [vmem:[%s3305_s18 + $0x18] sm:$0xff]   ;;  %v929_v17 = vld [vmem:[%s3306_s30 + $0x8] sm:$0xff] }
  0x2e   : > { %v931_v18 = vpack.c.bf16 %v929_v17, %v929_v17  ;;  %v2618_v19 = vld [vmem:[%s3305_s18 + $0x10] sm:$0xff]   ;;  %v2619_v20 = vld [vmem:[%s3305_s18 + $0x48] sm:$0xff]   ;;  %v2621_v22 = vld [vmem:[%s3305_s18 + $0x40] sm:$0xff]  }
  0x2f   : > { %v2620_v21 = vld [vmem:[%s3305_s18 + $0x8] sm:$0xff]   ;;  %v2622_v23 = vld [vmem:[%s3305_s18] sm:$0xff]  }
  0x30   : > { %2370 = vmatpush3.bf16.msra.mxu0 %v2610_v9  ;;  %1092 = vmatprep.mubr.bf16.mxu0 %v931_v18  ;;  %v928_v24 = vld [vmem:[%s3306_s30] sm:$0xff] }
  0x31   : > { %2371 = vmatprep.subr.bf16.mxu0 %v2611_v10  ;;  %v930_v25 = vpack.c.bf16 %v928_v24, %v928_v24  ;;  %v2314_v28 = vld [vmem:[%s3307_s7] ss:$0 sm:$0xff] }
  0x32   : > { %v2315_v30 = vld [vmem:[%s3308_s27] ss:$0 sm:$0xff] }
  0x33   : > { %v1117_v33 = vld [vmem:[%s3309_s29] sm:$0xff] }
  0x34   : > { %2372 = vmatpush3.bf16.msra.mxu0 %v2612_v11 }
  0x35   : > { %2373 = vmatprep.subr.bf16.mxu0 %v2613_v12 }
  0x38   : > { %2374 = vmatpush3.bf16.msra.mxu0 %v2614_v13 }
  0x39   : > { %2375 = vmatprep.subr.bf16.mxu0 %v2615_v14 }
  0x3c   : > { %2376 = vmatpush3.bf16.msra.mxu0 %v2616_v15 }
  0x3d   : > { %2377 = vmatprep.subr.bf16.mxu0 %v2617_v16 }
  0x40   : > { %2378 = vmatpush3.bf16.msra.mxu0 %v2618_v19 }
  0x41   : > { %2379 = vmatprep.subr.bf16.mxu0 %v2619_v20 }
  0x44   : > { %2380 = vmatpush3.bf16.msra.mxu0 %v2620_v21 }
  0x45   : > { %2381 = vmatprep.subr.bf16.mxu0 %v2621_v22 }
  0x48   : > { %2382 = vmatpush3.bf16.msra.mxu0 %v2622_v23 }
  0x4b   : > { %1093 = vmatmul.mubr.bf16.vlgmr.msra.gmra.mxu0 %v930_v25 }
 0x10b   : > { %v2383_v26 = vpop.f32.mrf.mxu0 }
 0x10d   : > { %v2384_v27 = vpop.f32.mrf.mxu0 }
 0x10e   : > { %v2385_v29 = vadd.f32 %v2384_v27, %v2383_v26 }
 0x10f   : > { %v2386_v31 = vpop.f32.mrf.mxu0 }
 0x110   : > { %v1107_v32 = vadd.f32 %v2385_v29, %v2314_v28 }
 0x111   : > { %v2387_v34 = vpop.f32.mrf.mxu0 }
 0x112   : > { %v1116_v35 = vsel %vm1108_vm2, %v2315_v30, %v1107_v32 }
 0x113   : > { %v1118_v36 = vadd.f32 %v1117_v33, %v1116_v35 }
 0x115   : > { %v1119_v37 = vmul.f32 %v2906_v5, %v1118_v36 }
 0x117   : > { %1120 = vst [vmem:[#allocation2] sm:$0xff] %v1119_v37 }
 0x118 PF: > { %2435 = vmatprep.subr.bf16.mxu0 %v2715_v3  ;;  %2455 = vmatprep.subr.bf16.mxu1 %v2715_v3  ;;  %v2623_v39 = vld [vmem:[%s2916_s19 + $0x38] sm:$0xff]   ;;  %v2624_v40 = vld [vmem:[%s2916_s19 + $0x30] sm:$0xff]   ;;  %v2625_v46 = vld [vmem:[%s2916_s19 + $0x28] sm:$0xff]   ;;  %vm2716_vm3 = vmmov 0   ;;  %s3310_s21 = sld [smem:[#allocation14_spill]]  ;;  %s3314_s6 = scalar_lea.vmem %s3260_s8, %s2889_s2  ;;  %vm1267_vm4 = vcmask 64512  }
 0x119   : > { %2436 = vmatpush3.bf16.msra.mxu0 %v2623_v39  ;;  %v2626_v47 = vld [vmem:[%s2916_s19 + $0x20] sm:$0xff]   ;;  %2451 = vmatprep.mubr.msk.bf16.mxu0 %vm2716_vm3, %v2715_v3  ;;  %v2627_v48 = vld [vmem:[%s2916_s19 + $0x18] sm:$0xff]   ;;  %v2628_v49 = vld [vmem:[%s2916_s19 + $0x10] sm:$0xff]   ;;  %s2717_s29 = smov 64   ;;  %s2718_s26 = smov 96   ;;  %vm1333_vm5 = vcmask 1043456  }
 0x11a   : > { %2437 = vmatprep.subr.bf16.mxu0 %v2715_v3  ;;  %2457 = vmatprep.mubr.msk.bf16.mxu1 %vm2716_vm3, %v2715_v3  ;;  %v2629_v50 = vld [vmem:[%s2916_s19 + $0x8] sm:$0xff]   ;;  %v2630_v51 = vld [vmem:[%s2916_s19] sm:$0xff]   ;;  %s3312_s19 = sld [smem:[#allocation15_spill]]  ;;  %vm1262_vm6 = vcmp.lt.s32.totalorder %v2884_v1, 5  ;;  %s2719_s1 = smov 80   ;;  %vm1726_vm7 = vcmask 130048  }
 0x11b   : > { %v2318_v62 = vld [vmem:[%s3314_s6] ss:$0 sm:$0xff]  ;;  %s2722_s7 = smov 112   ;;  %s2723_s25 = smov 72   ;;  %vm1728_vm8 = vcmask 195584   ;;  %vm1747_vm9 = vcmask 261120  }
 0x11c   : > { %s2726_s27 = smov 56   ;;  %s2727_s30 = smov 40  }
 0x11d   : > { %2438 = vmatpush3.bf16.msra.mxu0 %v2624_v40  ;;  %s2728_s6 = smov 8   ;;  %p2359_p8 = scmp.ne.s32.totalorder %s2697_s4, 1 }
 0x11e   : > { %v3025_v38 = vld [vmem:[#allocation2] sm:$0xff]  ;;  %2439 = vmatprep.subr.bf16.mxu0 %v2715_v3  ;;  %s3311_s22 = scalar_lea.vmem %s3310_s21, %s2889_s2  ;;  %s2720_s21 = smov 88  }
 0x11f   : > { %1124 = vadd.xlane.f32.xlu0 %v3025_v38  ;;  %v2316_v56 = vld [vmem:[%s3311_s22] ss:$0 sm:$0xff]  ;;  %s2721_s22 = smov 120   ;;  %s3318_s4 = sld [smem:[#allocation22_spill]] (!%p2359_p8) }
 0x120   : > { %s3313_s5 = scalar_lea.vmem %s3312_s19, %s2889_s2  ;;  %s2724_s19 = smov 104  }
 0x121   : > { %2440 = vmatpush3.bf16.msra.mxu0 %v2625_v46  ;;  %v2317_v58 = vld [vmem:[%s3313_s5] ss:$0 sm:$0xff]  ;;  %s2725_s5 = smov 48  }
 0x122   : > { %2441 = vmatprep.subr.bf16.mxu0 %v2715_v3 }
 0x125   : > { %2442 = vmatpush3.bf16.msra.mxu0 %v2626_v47 }
 0x126   : > { %2443 = vmatprep.subr.bf16.mxu0 %v2715_v3 }
 0x129   : > { %2444 = vmatpush3.bf16.msra.mxu0 %v2627_v48 }
 0x12a   : > { %2445 = vmatprep.subr.bf16.mxu0 %v2715_v3 }
 0x12d   : > { %2446 = vmatpush3.bf16.msra.mxu0 %v2628_v49 }
 0x12e   : > { %2447 = vmatprep.subr.bf16.mxu0 %v2715_v3 }
 0x131   : > { %2448 = vmatpush3.bf16.msra.mxu0 %v2629_v50 }
 0x132   : > { %2449 = vmatprep.subr.bf16.mxu0 %v2715_v3 }
 0x135   : > { %2450 = vmatpush3.bf16.msra.mxu0 %v2630_v51 }
 0x136   : > { %2479 = vmatprep.subr.bf16.mxu0 %v2715_v3 }
 0x1a8   : > { %v1125_v41 = vpop.xlane.xlu0 %1124 }
 0x1a9   : > { %v1126_v42 = vmul.f32 0.03125, %v1125_v41 }
 0x1ab   : > { %v1127_v43 = vsub.f32 %v3025_v38, %v1126_v42 }
 0x1ad   : > { %v1128_v44 = vmul.f32 %v2903_v4, %v1127_v43 }
 0x1af   : > { %v1129_v45 = vmul.f32 %v1128_v44, %v1128_v44 }
 0x1b1   : > { %1130 = vadd.xlane.f32.xlu0 %v1129_v45 }
 0x23a   : > { %v1131_v52 = vpop.xlane.xlu0 %1130 }
 0x23b   : > { %v1132_v53 = vmul.f32 0.03125, %v1131_v52 }
 0x23d   : > { %v1133_v54 = vadd.f32 1e-06, %v1132_v53 }
 0x23f   : > { %2649 = vrsqrt.f32 %v1133_v54 }
 0x24c   : > { %v2650_v55 = vpop.eup %2649 }
 0x24d   : > { %v1135_v57 = vmul.f32 %v2650_v55, %v1128_v44 }
 0x24f   : > { %v1142_v59 = vmul.f32 %v2316_v56, %v1135_v57 }
 0x251   : > { %v1149_v60 = vadd.f32 %v2317_v58, %v1142_v59 }
 0x253   : > { %v1150_v61 = vpack.c.bf16 %v1149_v60, %v1149_v60 }
 0x255   : > { %2452 = vmatmul.mubr.bf16.vlgmr.msra.gmra.mxu0 %v1150_v61 }
 0x256   : > { %2481 = vmatprep.mubr.msk.bf16.mxu0 %vm2716_vm3, %v2715_v3 }
 0x315   : > { %v1256_v63 = vpop.f32.mrf.mxu0 }
 0x316   : > { %v1257_v0 = vadd.f32 %v2318_v62, %v1256_v63 }
 0x317   : > { %v2453_v2 = vpop.f32.mrf.mxu0 }
 0x318   : > { %v3069_v6 = vpack.c.bf16 %v1257_v0, %v1257_v0 }
 0x319   : > { %v1259_v7 = vpop.f32.mrf.mxu0 }
 0x31a   : > { %1328 = vrot.lane.b32.xlu0 %v3069_v6, %s2717_s29  ;;  %1265 = vrot.lane.b32.xlu1 %v3069_v6, %s2718_s26  ;;  %s2729_s29 = smov 16   ;;  %s2730_s26 = smov 24  }
 0x31b   : > { %v2454_v8 = vpop.f32.mrf.mxu0 }
 0x38c   : > { %v1266_v9 = vpop.permute.xlu1 %1265  ;;  %v1329_v11 = vpop.permute.xlu0 %1328 }
 0x38d   : > { %v1272_v10 = vsel %vm1267_vm4, %v1266_v9, 0  ;;  %v1335_v12 = vsel %vm1333_vm5, %v1329_v11, 0 }
 0x38e   : > { %2456 = vmatpush3.bf16.xpose.msra.mxu1 %v1272_v10 }
 0x38f   : > { %2461 = vmatprep.subr.bf16.mxu1 %v2715_v3 }
 0x395   : > { %2458 = vmatmul.mubr.msk.bf16.vlgmr.msra.gmra.mxu1 %vm1267_vm4, %v3069_v6 }
 0x396   : > { %2462 = vmatpush3.bf16.msra.mxu1 %v1335_v12  ;;  %2463 = vmatprep.mubr.msk.bf16.mxu1 %vm2716_vm3, %v2715_v3 }
 0x397   : > { %2467 = vmatprep.subr.bf16.mxu1 %v2715_v3 }
 0x455   : > { %v1308_v13 = vpop.f32.mrf.mxu1 }
 0x456   : > { %v1314_v14 = vmul.f32 0.35355338, %v1308_v13 }
 0x457   : > { %v2459_v15 = vpop.f32.mrf.mxu1 }
 0x458   : > { %v1315_v16 = vsel %vm1262_vm6, %v1314_v14, -1e+30 }
 0x459   : > { %v1311_v17 = vpop.f32.mrf.mxu1  ;;  %v1316_v18 = vsel %vm1267_vm4, %v1315_v16, -inf }
 0x45a   : > { %1317 = vmax.xlane.f32.xlu1 %v1316_v18 }
 0x45b   : > { %v2460_v19 = vpop.f32.mrf.mxu1 }
 0x46b   : > { %1491 = vrot.lane.b32.xlu1 %v3069_v6, %s2719_s1 }
 0x4e3   : > { %v1318_v20 = vpop.xlane.xlu1 %1317 }
 0x4e4   : > { %v1319_v21 = vsub.f32 %v1315_v16, %v1318_v20 }
 0x4e6   : > { %v1320_v22 = vmul.f32 1.442695, %v1319_v21 }
 0x4e7   : > { %v1492_v23 = vpop.permute.xlu1 %1491 }
 0x4e8   : > { %2651 = vpow2.f32 %v1320_v22  ;;  %v1497_v24 = vsel %vm1267_vm4, %v1492_v23, 0 }
 0x4e9   : > { %2480 = vmatpush3.bf16.xpose.msra.mxu0 %v1497_v24 }
 0x4ea   : > { %2491 = vmatprep.subr.bf16.mxu0 %v2715_v3 }
 0x4f5   : > { %v2652_v25 = vpop.eup %2651 }
 0x4f6   : > { %v1322_v26 = vsel %vm1267_vm4, %v2652_v25, 0.0 }
 0x4f7   : > { %1323 = vadd.xlane.f32.xlu0 %v1322_v26 }
 0x50d   : > { %1379 = vrot.lane.b32.xlu0 %v3069_v6, %s2720_s21  ;;  %s3315_s21 = scalar_lea.vmem %s3262_s10, %s2889_s2 }
 0x511   : > { %1377 = vrot.lane.b32.xlu0 %v3069_v6, %s2721_s22 }
 0x515   : > { %1489 = vrot.lane.b32.xlu0 %v3069_v6, %s2722_s7  ;;  %s3316_s7 = scalar_lea.vmem %s3263_s11, %s2889_s2 }
 0x519   : > { %1603 = vrot.lane.b32.xlu0 %v3069_v6, %s2723_s25 }
 0x51d   : > { %1601 = vrot.lane.b32.xlu0 %v3069_v6, %s2724_s19 }
 0x580   : > { %v1324_v27 = vpop.xlane.xlu0 %1323 }
 0x581   : > { %2653 = vrcp.f32 %v1324_v27 }
 0x584   : > { %v1380_v28 = vpop.permute.xlu0 %1379 }
 0x585   : > { %v1385_v36 = vsel %vm1267_vm4, %v1380_v28, 0 }
 0x588   : > { %v1378_v29 = vpop.permute.xlu0 %1377 }
 0x58c   : > { %v1490_v30 = vpop.permute.xlu0 %1489 }
 0x58d   : > { %2482 = vmatmul.mubr.msk.bf16.vlgmr.msra.gmra.mxu0 %vm1267_vm4, %v1490_v30 }
 0x58e   : > { %v2654_v31 = vpop.eup %2653  ;;  %2493 = vmatprep.mubr.msk.bf16.mxu0 %vm2716_vm3, %v2715_v3 }
 0x58f   : > { %v1326_v32 = vmul.f32 %v2654_v31, %v2652_v25 }
 0x590   : > { %v1604_v33 = vpop.permute.xlu0 %1603 }
 0x591   : > { %v1609_v34 = vsel %vm1267_vm4, %v1604_v33, 0  ;;  %v1327_v35 = vpack.c.bf16 %v1326_v32, %v1326_v32 }
 0x592   : > { %2492 = vmatpush3.bf16.xpose.msra.mxu0 %v1609_v34 }
 0x593   : > { %2464 = vmatmul.mubr.msk.bf16.vlgmr.msra.gmra.mxu1 %vm1267_vm4, %v1327_v35  ;;  %2503 = vmatprep.subr.bf16.mxu0 %v2715_v3 }
 0x594   : > { %2468 = vmatpush3.bf16.xpose.msra.mxu1 %v1385_v36  ;;  %2469 = vmatprep.mubr.msk.bf16.mxu1 %vm2716_vm3, %v2715_v3  ;;  %v1602_v37 = vpop.permute.xlu0 %1601  ;;  %v2631_v36 = vld [vmem:[%s2930_s24 + $0x8] sm:$0xff]  }
 0x595   : > { %2473 = vmatprep.subr.bf16.mxu1 %v2715_v3 }
 0x599   : > { %2494 = vmatmul.mubr.msk.bf16.vlgmr.msra.gmra.mxu0 %vm1267_vm4, %v1602_v37  ;;  %v2632_v37 = vld [vmem:[%s2930_s24] sm:$0xff]  }
 0x59a   : > { %2507 = vmatprep.mubr.msk.bf16.mxu0 %vm2716_vm3, %v2715_v3  ;;  %2504 = vmatpush3.bf16.msra.mxu0 %v2631_v36 }
 0x59b   : > { %2470 = vmatmul.mubr.msk.bf16.vlgmr.msra.gmra.mxu1 %vm1267_vm4, %v1378_v29  ;;  %2505 = vmatprep.subr.bf16.mxu0 %v2715_v3 }
 0x59c   : > { %2475 = vmatprep.mubr.msk.bf16.mxu1 %vm2716_vm3, %v2715_v3 }
 0x59e   : > { %2506 = vmatpush3.bf16.msra.mxu0 %v2632_v37 }
 0x59f   : > { %2531 = vmatprep.subr.bf16.mxu0 %v2715_v3 }
 0x64d   : > { %v1533_v39 = vpop.f32.mrf.mxu0 }
 0x64e   : > { %v1539_v40 = vmul.f32 0.35355338, %v1533_v39 }
 0x64f   : > { %v2483_v41 = vpop.f32.mrf.mxu0 }
 0x650   : > { %v1540_v42 = vsel %vm1262_vm6, %v1539_v40, -1e+30 }
 0x651   : > { %v1536_v43 = vpop.f32.mrf.mxu0  ;;  %v1541_v44 = vsel %vm1267_vm4, %v1540_v42, -inf }
 0x652   : > { %1542 = vmax.xlane.f32.xlu1 %v1541_v44 }
 0x653   : > { %v3113_v45 = vpop.f32.mrf.mxu1  ;;  %v2484_v46 = vpop.f32.mrf.mxu0 }
 0x655   : > { %v2465_v47 = vpop.f32.mrf.mxu1 }
 0x657   : > { %v1374_v48 = vpop.f32.mrf.mxu1 }
 0x659   : > { %v2466_v49 = vpop.f32.mrf.mxu1  ;;  %v1645_v50 = vpop.f32.mrf.mxu0 }
 0x65a   : > { %v1651_v53 = vmul.f32 0.35355338, %v1645_v50 }
 0x65b   : > { %v1421_v51 = vpop.f32.mrf.mxu1  ;;  %v2495_v52 = vpop.f32.mrf.mxu0 }
 0x65c   : > { %v1427_v54 = vmul.f32 0.35355338, %v1421_v51  ;;  %v1652_v61 = vsel %vm1262_vm6, %v1651_v53, -1e+30 }
 0x65d   : > { %v2471_v55 = vpop.f32.mrf.mxu1  ;;  %v1648_v56 = vpop.f32.mrf.mxu0  ;;  %v1653_v63 = vsel %vm1267_vm4, %v1652_v61, -inf }
 0x65e   : > { %v1428_v57 = vsel %vm1262_vm6, %v1427_v54, -1e+30 }
 0x65f   : > { %v1424_v58 = vpop.f32.mrf.mxu1  ;;  %v2496_v59 = vpop.f32.mrf.mxu0  ;;  %v1429_v60 = vsel %vm1267_vm4, %v1428_v57, -inf }
 0x660   : > { %1430 = vmax.xlane.f32.xlu0 %v1429_v60  ;;  %v2338_v60 = vld [vmem:[%s3315_s21] ss:$0 sm:$0xff]  ;;  %s3320_s21 = sld [smem:[#allocation18_spill]] (!%p2359_p8) }
 0x661   : > { %v2472_v62 = vpop.f32.mrf.mxu1 }
 0x664   : > { %1654 = vmax.xlane.f32.xlu0 %v1653_v63 }
 0x6db   : > { %v1543_v0 = vpop.xlane.xlu1 %1542 }
 0x6dc   : > { %v1544_v2 = vsub.f32 %v1540_v42, %v1543_v0 }
 0x6de   : > { %v1545_v7 = vmul.f32 1.442695, %v1544_v2  ;;  %v2633_v2 = vld [vmem:[%s2943_s0 + $0x38] sm:$0xff]  }
 0x6e0   : > { %2655 = vpow2.f32 %v1545_v7  ;;  %v2634_v7 = vld [vmem:[%s2943_s0 + $0x30] sm:$0xff]  }
 0x6e9   : > { %v1431_v8 = vpop.xlane.xlu0 %1430 }
 0x6ea   : > { %v1432_v9 = vsub.f32 %v1428_v57, %v1431_v8 }
 0x6ec   : > { %v1433_v10 = vmul.f32 1.442695, %v1432_v9 }
 0x6ed   : > { %v2656_v11 = vpop.eup %2655  ;;  %v1655_v12 = vpop.xlane.xlu0 %1654 }
 0x6ee   : > { %2657 = vpow2.f32 %v1433_v10  ;;  %v1656_v13 = vsub.f32 %v1652_v61, %v1655_v12  ;;  %v1547_v14 = vsel %vm1267_vm4, %v2656_v11, 0.0  ;;  %v2635_v12 = vld [vmem:[%s2943_s0 + $0x28] sm:$0xff]  }
 0x6ef   : > { %1548 = vadd.xlane.f32.xlu0 %v1547_v14  ;;  %v2637_v14 = vld [vmem:[%s2943_s0 + $0x18] sm:$0xff]  }
 0x6f0   : > { %v1657_v1 = vmul.f32 1.442695, %v1656_v13  ;;  %v2636_v13 = vld [vmem:[%s2943_s0 + $0x20] sm:$0xff]  }
 0x6f2   : > { %2659 = vpow2.f32 %v1657_v1  ;;  %v2638_v1 = vld [vmem:[%s2943_s0 + $0x10] sm:$0xff]  }
 0x6fb   : > { %v2658_v15 = vpop.eup %2657 }
 0x6fc   : > { %v1435_v16 = vsel %vm1267_vm4, %v2658_v15, 0.0 }
 0x6fd   : > { %1436 = vadd.xlane.f32.xlu0 %v1435_v16  ;;  %v2640_v16 = vld [vmem:[%s2943_s0] sm:$0xff]  }
 0x6ff   : > { %v2660_v17 = vpop.eup %2659 }
 0x700   : > { %v1659_v18 = vsel %vm1267_vm4, %v2660_v17, 0.0 }
 0x701   : > { %1660 = vadd.xlane.f32.xlu1 %v1659_v18  ;;  %v2642_v18 = vld [vmem:[%s2952_s3 + $0x30] sm:$0xff]  }
 0x712   : > { %1553 = vrot.lane.b32.xlu1 %v3069_v6, %s2725_s5  ;;  %s3317_s5 = scalar_lea.vmem %s3264_s12, %s2889_s2 }
 0x713   : > { %1441 = vrot.lane.b32.xlu0 %v3069_v6, %s2726_s27 }
 0x716   : > { %1665 = vrot.lane.b32.xlu1 %v3069_v6, %s2727_s30 }
 0x778   : > { %v1549_v19 = vpop.xlane.xlu0 %1548 }
 0x786   : > { %v1437_v20 = vpop.xlane.xlu0 %1436 }
 0x787   : > { %2661 = vrcp.f32 %v1437_v20 }
 0x788   : > { %2663 = vrcp.f32 %v1549_v19 }
 0x78a   : > { %v1442_v21 = vpop.permute.xlu0 %1441  ;;  %v1661_v23 = vpop.xlane.xlu1 %1660 }
 0x78b   : > { %v1447_v22 = vsel %vm1333_vm5, %v1442_v21, 0  ;;  %2665 = vrcp.f32 %v1661_v23  ;;  %v2339_v23 = vld [vmem:[%s3316_s7] ss:$0 sm:$0xff]  ;;  %s3321_s7 = sld [smem:[#allocation21_spill]] (!%p2359_p8) }
 0x78c   : > { %2474 = vmatpush3.bf16.msra.mxu1 %v1447_v22 }
 0x78d   : > { %2485 = vmatprep.subr.bf16.mxu1 %v2715_v3 }
 0x78e   : > { %v1554_v26 = vpop.permute.xlu1 %1553 }
 0x78f   : > { %v1559_v29 = vsel %vm1333_vm5, %v1554_v26, 0 }
 0x792   : > { %v1666_v30 = vpop.permute.xlu1 %1665 }
 0x793   : > { %v1671_v33 = vsel %vm1333_vm5, %v1666_v30, 0  ;;  %v2645_v30 = vld [vmem:[%s2952_s3 + $0x18] sm:$0xff]  }
 0x794   : > { %v2662_v24 = vpop.eup %2661 }
 0x795   : > { %v1439_v25 = vmul.f32 %v2662_v24, %v2658_v15  ;;  %v2664_v28 = vpop.eup %2663  ;;  %v2639_v15 = vld [vmem:[%s2943_s0 + $0x8] sm:$0xff]  }
 0x796   : > { %v1551_v6 = vmul.f32 %v2664_v28, %v2656_v11 }
 0x797   : > { %v1440_v27 = vpack.c.bf16 %v1439_v25, %v1439_v25  ;;  %v2340_v25 = vld [vmem:[%s3317_s5] ss:$0 sm:$0xff]  ;;  %s3322_s5 = sld [smem:[#allocation19_spill]] (!%p2359_p8) }
 0x798   : > { %v1552_v31 = vpack.c.bf16 %v1551_v6, %v1551_v6  ;;  %v2666_v32 = vpop.eup %2665  ;;  %v2644_v6 = vld [vmem:[%s2952_s3 + $0x20] sm:$0xff]  }
 0x799   : > { %2476 = vmatmul.mubr.msk.bf16.vlgmr.msra.gmra.mxu1 %vm1267_vm4, %v1440_v27  ;;  %v1663_v34 = vmul.f32 %v2666_v32, %v2660_v17  ;;  %v2641_v17 = vld [vmem:[%s2952_s3 + $0x38] sm:$0xff]   ;;  %v2647_v32 = vld [vmem:[%s2952_s3 + $0x8] sm:$0xff]  }
 0x79a   : > { %2486 = vmatpush3.bf16.msra.mxu1 %v1559_v29  ;;  %2487 = vmatprep.mubr.msk.bf16.mxu1 %vm2716_vm3, %v2715_v3  ;;  %v2643_v29 = vld [vmem:[%s2952_s3 + $0x28] sm:$0xff]  }
 0x79b   : > { %2497 = vmatprep.subr.bf16.mxu1 %v2715_v3  ;;  %v1664_v35 = vpack.c.bf16 %v1663_v34, %v1663_v34  ;;  %v2341_v34 = vld [vmem:[%s900_s17] ss:$0 sm:$0xff] }
 0x7a1   : > { %2488 = vmatmul.mubr.msk.bf16.vlgmr.msra.gmra.mxu1 %vm1267_vm4, %v1552_v31  ;;  %v2646_v31 = vld [vmem:[%s2952_s3 + $0x10] sm:$0xff]  }
 0x7a2   : > { %2498 = vmatpush3.bf16.msra.mxu1 %v1671_v33  ;;  %2499 = vmatprep.mubr.msk.bf16.mxu1 %vm2716_vm3, %v2715_v3  ;;  %v2648_v33 = vld [vmem:[%s2952_s3] sm:$0xff]   ;;  %s3323_s3 = sld [smem:[#allocation20_spill]] (!%p2359_p8) }
 0x7a3   : > { %2511 = vmatprep.subr.bf16.mxu1 %v2715_v3 }
 0x7a9   : > { %2500 = vmatmul.mubr.msk.bf16.vlgmr.msra.gmra.mxu1 %vm1267_vm4, %v1664_v35 }
 0x7aa   : > { %2527 = vmatprep.mubr.msk.bf16.mxu1 %vm2716_vm3, %v2715_v3  ;;  %2512 = vmatpush3.bf16.msra.mxu1 %v2633_v2 }
 0x7ab   : > { %2513 = vmatprep.subr.bf16.mxu1 %v2715_v3 }
 0x7ae   : > { %2514 = vmatpush3.bf16.msra.mxu1 %v2634_v7 }
 0x7af   : > { %2515 = vmatprep.subr.bf16.mxu1 %v2715_v3 }
 0x7b2   : > { %2516 = vmatpush3.bf16.msra.mxu1 %v2635_v12 }
 0x7b3   : > { %2517 = vmatprep.subr.bf16.mxu1 %v2715_v3 }
 0x7b6   : > { %2518 = vmatpush3.bf16.msra.mxu1 %v2636_v13 }
 0x7b7   : > { %2519 = vmatprep.subr.bf16.mxu1 %v2715_v3 }
 0x7ba   : > { %2520 = vmatpush3.bf16.msra.mxu1 %v2637_v14 }
 0x7bb   : > { %2521 = vmatprep.subr.bf16.mxu1 %v2715_v3 }
 0x7be   : > { %2522 = vmatpush3.bf16.msra.mxu1 %v2638_v1 }
 0x7bf   : > { %2523 = vmatprep.subr.bf16.mxu1 %v2715_v3 }
 0x7c2   : > { %2524 = vmatpush3.bf16.msra.mxu1 %v2639_v15 }
 0x7c3   : > { %2525 = vmatprep.subr.bf16.mxu1 %v2715_v3 }
 0x7c6   : > { %2526 = vmatpush3.bf16.msra.mxu1 %v2640_v16 }
 0x859   : > { %v1483_v39 = vpop.f32.mrf.mxu1 }
 0x85a   : > { %1714 = vrot.lane.b32.xlu1 %v1483_v39, %s2728_s6 }
 0x85b   : > { %v2477_v40 = vpop.f32.mrf.mxu1 }
 0x85d   : > { %v1486_v41 = vpop.f32.mrf.mxu1 }
 0x85f   : > { %v2478_v42 = vpop.f32.mrf.mxu1 }
 0x861   : > { %v1595_v43 = vpop.f32.mrf.mxu1 }
 0x862   : > { %1718 = vrot.lane.b32.xlu0 %v1595_v43, %s2729_s29 }
 0x863   : > { %v2489_v44 = vpop.f32.mrf.mxu1 }
 0x865   : > { %v1598_v46 = vpop.f32.mrf.mxu1 }
 0x867   : > { %v2490_v47 = vpop.f32.mrf.mxu1 }
 0x868   : > { %v2350_v47 = vld [vmem:[%s908_s28] ss:$0 sm:$0xff] }
 0x869   : > { %v1707_v48 = vpop.f32.mrf.mxu1 }
 0x86a   : > { %1722 = vrot.lane.b32.xlu1 %v1707_v48, %s2730_s26  ;;  %s3319_s26 = sld [smem:[#allocation17_spill]] (!%p2359_p8) }
 0x86b   : > { %v2501_v49 = vpop.f32.mrf.mxu1 }
 0x86d   : > { %v1710_v50 = vpop.f32.mrf.mxu1 }
 0x86f   : > { %v2502_v51 = vpop.f32.mrf.mxu1 }
 0x8cc   : > { %v1715_v52 = vpop.permute.xlu1 %1714 }
 0x8cd   : > { %v1725_v54 = vsel %vm1267_vm4, %v3113_v45, %v1715_v52 }
 0x8d4   : > { %v1719_v53 = vpop.permute.xlu0 %1718 }
 0x8d5   : > { %v1727_v55 = vsel %vm1726_vm7, %v1725_v54, %v1719_v53 }
 0x8dc   : > { %v1723_v56 = vpop.permute.xlu1 %1722 }
 0x8dd   : > { %v1729_v57 = vsel %vm1728_vm8, %v1727_v55, %v1723_v56 }
 0x8de   : > { %v1730_v58 = vpack.c.bf16 %v1729_v57, %v1729_v57 }
 0x8e0   : > { %2508 = vmatmul.mubr.msk.bf16.vlgmr.msra.gmra.mxu0 %vm1747_vm9, %v1730_v58 }
 0x8e1   : > { %2547 = vmatprep.mubr.msk.bf16.mxu0 %vm2716_vm3, %v2715_v3  ;;  %2532 = vmatpush3.bf16.msra.mxu0 %v2641_v17 }
 0x8e2   : > { %2533 = vmatprep.subr.bf16.mxu0 %v2715_v3 }
 0x8e5   : > { %2534 = vmatpush3.bf16.msra.mxu0 %v2642_v18 }
 0x8e6   : > { %2535 = vmatprep.subr.bf16.mxu0 %v2715_v3 }
 0x8e9   : > { %2536 = vmatpush3.bf16.msra.mxu0 %v2643_v29 }
 0x8ea   : > { %2537 = vmatprep.subr.bf16.mxu0 %v2715_v3 }
 0x8ed   : > { %2538 = vmatpush3.bf16.msra.mxu0 %v2644_v6 }
 0x8ee   : > { %2539 = vmatprep.subr.bf16.mxu0 %v2715_v3 }
 0x8f1   : > { %2540 = vmatpush3.bf16.msra.mxu0 %v2645_v30 }
 0x8f2   : > { %2541 = vmatprep.subr.bf16.mxu0 %v2715_v3 }
 0x8f5   : > { %2542 = vmatpush3.bf16.msra.mxu0 %v2646_v31 }
 0x8f6   : > { %2543 = vmatprep.subr.bf16.mxu0 %v2715_v3 }
 0x8f9   : > { %2544 = vmatpush3.bf16.msra.mxu0 %v2647_v32 }
 0x8fa   : > { %2545 = vmatprep.subr.bf16.mxu0 %v2715_v3 }
 0x8fd   : > { %2546 = vmatpush3.bf16.msra.mxu0 %v2648_v33 }
 0x9a0   : > { %v1785_v59 = vpop.f32.mrf.mxu0 }
 0x9a1   : > { %v1791_v61 = vadd.f32 %v1785_v59, %v3025_v38 }
 0x9a2   : > { %v2509_v45 = vpop.f32.mrf.mxu0 }
 0x9a3   : > { %v3156_v62 = vadd.f32 %v2338_v60, %v1791_v61 }
 0x9a4   : > { %v1788_v63 = vpop.f32.mrf.mxu0 }
 0x9a5   : > { %1802 = vadd.xlane.f32.xlu0 %v3156_v62 }
 0x9a6   : > { %v2510_v0 = vpop.f32.mrf.mxu0 }
 0xa2e   : > { %v1803_v38 = vpop.xlane.xlu0 %1802 }
 0xa2f   : > { %v1804_v8 = vmul.f32 0.03125, %v1803_v38 }
 0xa31   : > { %v1805_v9 = vsub.f32 %v3156_v62, %v1804_v8 }
 0xa33   : > { %v1806_v10 = vmul.f32 %v2903_v4, %v1805_v9 }
 0xa35   : > { %v1807_v11 = vmul.f32 %v1806_v10, %v1806_v10 }
 0xa37   : > { %1808 = vadd.xlane.f32.xlu1 %v1807_v11 }
 0xac0   : > { %v1809_v19 = vpop.xlane.xlu1 %1808 }
 0xac1   : > { %v1810_v20 = vmul.f32 0.03125, %v1809_v19 }
 0xac3   : > { %v1811_v21 = vadd.f32 1e-06, %v1810_v20 }
 0xac5   : > { %2667 = vrsqrt.f32 %v1811_v21 }
 0xad2   : > { %v2668_v22 = vpop.eup %2667 }
 0xad3   : > { %v1813_v24 = vmul.f32 %v2668_v22, %v1806_v10 }
 0xad5   : > { %v1820_v26 = vmul.f32 %v2339_v23, %v1813_v24 }
 0xad7   : > { %v1827_v27 = vadd.f32 %v2340_v25, %v1820_v26 }
 0xad9   : > { %v1828_v28 = vpack.c.bf16 %v1827_v27, %v1827_v27 }
 0xadb   : > { %2528 = vmatmul.mubr.bf16.vlgmr.msra.gmra.mxu1 %v1828_v28 }
 0xb9b   : > { %v1934_v35 = vpop.f32.mrf.mxu1 }
 0xb9c   : > { %v1935_v36 = vadd.f32 %v2341_v34, %v1934_v35 }
 0xb9d   : > { %v2529_v37 = vpop.f32.mrf.mxu1 }
 0xb9e   : > { %v1941_v39 = vmul.f32 0.70710677, %v1935_v36  ;;  %v1940_v43 = vmul.f32 0.5, %v1935_v36 }
 0xb9f   : > { %v1937_v40 = vpop.f32.mrf.mxu1 }
 0xba0   : > { %2669 = verf.f32 %v1941_v39 }
 0xba1   : > { %v2530_v41 = vpop.f32.mrf.mxu1 }
 0xbad   : > { %v2670_v42 = vpop.eup %2669 }
 0xbae   : > { %v1943_v44 = vadd.f32 1.0, %v2670_v42 }
 0xbb0   : > { %v1944_v46 = vmul.f32 %v1943_v44, %v1940_v43 }
 0xbb2   : > { %v1945_v3 = vpack.c.bf16 %v1944_v46, %v1944_v46 }
 0xbb4   : > { %2548 = vmatmul.mubr.bf16.vlgmr.msra.gmra.mxu0 %v1945_v3 }
 0xc74   : > { %v2051_v48 = vpop.f32.mrf.mxu0 }
 0xc75   : > { %v2052_v49 = vadd.f32 %v2350_v47, %v2051_v48 }
 0xc76   : > { %v2549_v50 = vpop.f32.mrf.mxu0 }
 0xc77   : > { %v2057_v51 = vadd.f32 %v2052_v49, %v3156_v62  ;;  %2063 = sbr.rel (%p2359_p8) target bundleno = 3517 (0xdbd), region = 120 }
 0xc78   : > { %v2054_v52 = vpop.f32.mrf.mxu0 }
 0xc79   : > { %v2058_v53 = vmul.f32 %v2906_v5, %v2057_v51 }
 0xc7a   : > { %v2550_v54 = vpop.f32.mrf.mxu0 }
 0xc7b   : > { %2059 = vst [vmem:[#allocation2] sm:$0xff] %v2058_v53 }
 0xc7c   : > { %vm2064_vm10 = vcmask 1040384   ;;  %v2085_v63 = vld [vmem:[%s3318_s4] sm:$0x1] }
 0xc7d   : > { %v2065_v55 = vsel %vm2064_vm10, %v2058_v53, 0.0  ;;  %v2086_v0 = vadd.f32 1e-05, %v2085_v63  ;;  %v2081_v38 = vld [vmem:[%s3320_s21] sm:$0x1] }
 0xc7e   : > { %2066 = vadd.xlane.f32.xlu0 %v2065_v55  ;;  %v2083_v9 = vld [vmem:[%s3321_s7] sm:$0x1] }
 0xc7f   : > { %v2089_v13 = vld [vmem:[%s3322_s5] sm:$0x1] }
 0xc80   : > { %v2091_v1 = vld [vmem:[%s3323_s3] sm:$0x1] }
 0xd07   : > { %v2067_v56 = vpop.xlane.xlu0 %2066 }
 0xd08   : > { %v2068_v57 = vmul.f32 0.03125, %v2067_v56 }
 0xd0a   : > { %v2069_v58 = vsub.f32 %v2058_v53, %v2068_v57 }
 0xd0c   : > { %v2070_v59 = vmul.f32 %v2903_v4, %v2069_v58  ;;  %v2079_v4 = vld [vmem:[%s3319_s26] sm:$0x1] }
 0xd0e   : > { %v2071_v60 = vmul.f32 %v2070_v59, %v2070_v59 }
 0xd10   : > { %v2072_v61 = vsel %vm2064_vm10, %v2071_v60, 0.0 }
 0xd11   : > { %2073 = vadd.xlane.f32.xlu0 %v2072_v61 }
 0xd9a   : > { %v2074_v45 = vpop.xlane.xlu0 %2073 }
 0xd9b   : > { %v2075_v5 = vmul.f32 0.03125, %v2074_v45 }
 0xd9d   : > { %v2076_v62 = vadd.f32 1e-06, %v2075_v5 }
 0xd9f   : > { %2671 = vrsqrt.f32 %v2076_v62 }
 0xda0   : > { %2673 = vrsqrt.f32 %v2086_v0 }
 0xdac   : > { %v2672_v2 = vpop.eup %2671 }
 0xdad   : > { %v2078_v7 = vmul.f32 %v2672_v2, %v2070_v59  ;;  %v2674_v11 = vpop.eup %2673 }
 0xdaf   : > { %v2080_v8 = vmul.f32 %v2079_v4, %v2078_v7 }
 0xdb1   : > { %v2082_v10 = vadd.f32 %v2081_v38, %v2080_v8 }
 0xdb3   : > { %v2084_v12 = vsub.f32 %v2082_v10, %v2083_v9 }
 0xdb5   : > { %v2088_v14 = vmul.f32 %v2674_v11, %v2084_v12 }
 0xdb7   : > { %v2090_v15 = vmul.f32 %v2089_v13, %v2088_v14 }
 0xdb9   : > { %v2092_v16 = vadd.f32 %v2091_v1, %v2090_v15 }
 0xdbb   : > { %v2093_v17 = vsel %vm2064_vm10, %v2092_v16, 0.0 }
 0xdbc   : > { %2094 = vst [vmem:[%s2961_s20] sm:$0xff] %v2093_v17 }
 0xdbd PF: > { %s3324_s6 = sld [smem:[#allocation5_spill]] }
 0xdbe   : > { %s3325_s4 = sld [smem:[#allocation3_spill]] }
 0xdbf   : > { %s3326_s30 = sld [smem:[#allocation4_spill]] }
 0xdc0   : > { %s3327_s24 = sld [smem:[#allocation6_spill]] }
 0xdc1   : > { %s3328_s25 = sld [smem:[#allocation7_spill]] }
 0xdc3   : > { %s33_s5 = sadd.s32 1, %s3324_s6  }
 0xdc4   : > { %p30_p9 = scmp.ge.s32.totalorder %s33_s5, 6  }
 0xdc6   :  { %32 = sbr.rel (!%p30_p9) target bundleno = 15 (0xf), region = 186 }

</bundles_post_ra>
